<compile_context>
chip_gen: v7x
topology: tpu7x:2x2x1
jax: 0.10.0
libtpu: 0.0.40
codegen_flags: <defaults>
</compile_context>

<pallas_src>
import jax
import jax.numpy as jnp
import numpy as np
from jax.experimental import pallas as pl
from jax.experimental.pallas import tpu as pltpu

LANE = 128


def _round_up(x, m):
    return ((x + m - 1) // m) * m


def make_supervisor_kernel(num_rnn_layers, T, Bblk, H, Gp, gate_stride, unroll):
    """Fused GRU stack + Linear + Sigmoid over one batch block.

    Ref layout (per grid step over batch blocks):
      x_ref:   (T, Bblk, F)      time-major input block (compute dtype)
      per layer l: w_ih (Fin_l, Gp), w_hh (H, Gp)  [compute dtype, gates packed]
                   b_gi (1, Gp) f32 [r: b_ir+b_hr | z: b_iz+b_hz | n: b_in]
                   b_hn (1, H)  f32
      w_lin (H, H) compute dtype, b_lin (1, H) f32
      out_ref: (T, Bblk, H) f32
      gi_ref:  (T*Bblk, Gp) scratch (compute dtype) - hoisted input projections
      seq_ref: (T*Bblk, H)  scratch (compute dtype) - current layer's sequence
    """
    n_in = 1 + 4 * num_rnn_layers + 2
    gs = gate_stride

    def kernel(*args):
        in_refs = args[:n_in]
        out_ref = args[n_in]
        gi_ref = args[n_in + 1]
        seq_ref = args[n_in + 2]
        x_ref = in_refs[0]

        for l in range(num_rnn_layers):
            w_ih = in_refs[1 + 4 * l][...]                      # (Fin, Gp)
            w_hh = in_refs[2 + 4 * l][...]                      # (H,  Gp)
            b_gi = in_refs[3 + 4 * l][...].astype(jnp.float32)  # (1, Gp)
            b_hn = in_refs[4 + 4 * l][...].astype(jnp.float32)  # (1, H)

            if l == 0:
                # (T, Bblk, F) -> (T*Bblk, F): layout-preserving because Bblk is
                # a multiple of the sublane packing of the compute dtype.
                inp = x_ref[...].reshape(T * Bblk, x_ref.shape[-1])
            else:
                inp = seq_ref[...]                              # (T*Bblk, H)

            # Hoisted input projection: all T steps in one MXU matmul.
            gi2 = jnp.dot(inp, w_ih, preferred_element_type=jnp.float32) + b_gi
            gi_ref[...] = gi2.astype(gi_ref.dtype)
            # Previous layer's sequence is now dead -> single seq buffer is
            # safe to overwrite in the time loop below.

            b_hn_b = jnp.broadcast_to(b_hn, (Bblk, H))          # hoisted
            mm_dtype = w_hh.dtype

            def step(t, h, w_hh=w_hh, b_hn_b=b_hn_b, mm_dtype=mm_dtype):
                row = pl.multiple_of(t * Bblk, Bblk)
                gi_t = gi_ref[pl.ds(row, Bblk), :].astype(jnp.float32)
                gh = jnp.dot(h.astype(mm_dtype), w_hh,
                             preferred_element_type=jnp.float32)
                g = gi_t + gh
                sg = jax.nn.sigmoid(g)
                # PyTorch GRU gate order: r, z, n (packed along the lane axis).
                r = sg[:, 0:H]
                z = sg[:, gs:gs + H]
                n = jnp.tanh(gi_t[:, 2 * gs:2 * gs + H]
                             + r * (gh[:, 2 * gs:2 * gs + H] + b_hn_b))
                h_new = n + z * (h - n)          # == (1 - z) * n + z * h
                seq_ref[pl.ds(row, Bblk), :] = h_new.astype(seq_ref.dtype)
                return h_new

            h0 = jnp.zeros((Bblk, H), jnp.float32)
            jax.lax.fori_loop(0, T, step, h0, unroll=unroll)

        # Final Linear(H, H) + Sigmoid over the whole sequence of this block.
        w_lin = in_refs[1 + 4 * num_rnn_layers][...]
        b_lin = in_refs[2 + 4 * num_rnn_layers][...].astype(jnp.float32)
        y = jnp.dot(seq_ref[...], w_lin, preferred_element_type=jnp.float32) + b_lin
        y = jax.nn.sigmoid(y)
        out_ref[...] = y.reshape(T, Bblk, H).astype(out_ref.dtype)

    return kernel


def supervisor_forward(x_btf, layers, lin_w, lin_b, *,
                       compute_dtype=jnp.bfloat16,
                       max_batch_block=256,
                       vmem_budget_bytes=40 * 2**20):
    """x_btf: (B, T, F). layers: list of (w_ih(3H,Fin), w_hh(3H,H), b_ih(3H,), b_hh(3H,))."""
    B, T, F = x_btf.shape
    H = int(lin_w.shape[0])
    L = len(layers)

    esz = jnp.dtype(compute_dtype).itemsize
    sub = 8 * (4 // esz)                 # sublane packing: 8 (f32) / 16 (bf16)
    Bp = _round_up(B, sub)

    # Pack the 3 GRU gates contiguously along lanes, pad the total gate axis to
    # a multiple of 128.  For 3*H <= 128 the gates share one lane block.
    gate_stride = H if 3 * H <= LANE else _round_up(H, LANE)
    Gp = _round_up(2 * gate_stride + H, LANE)

    def footprint(bblk):
        scratch = T * bblk * (Gp + H) * esz                 # gi + seq
        blocks = 2 * T * bblk * (F * esz + H * 4)           # x + f32 out, double-buffered
        return scratch + blocks

    # Batch tile: largest multiple of `sub`, shrunk until the per-block VMEM
    # footprint fits the budget (sized for v7x's 64 MiB VMEM with headroom).
    Bblk = min(Bp, _round_up(max_batch_block, sub))
    while Bblk > sub and footprint(Bblk) > vmem_budget_bytes:
        Bblk -= sub
    nb = (Bp + Bblk - 1) // Bblk
    Bp = nb * Bblk                       # re-pad so the grid tiles exactly

    # Time-major, batch-padded, compute-dtype input.
    x_tm = jnp.transpose(x_btf, (1, 0, 2)).astype(compute_dtype)   # (T, B, F)
    x_tm = jnp.pad(x_tm, ((0, 0), (0, Bp - B), (0, 0)))

    def pack_gate_weight(w, in_dim):
        # torch (3H, in_dim) -> (in_dim, Gp), transposed, gates at stride gate_stride.
        w_t = jnp.asarray(w, jnp.float32).T                         # (in_dim, 3H)
        out = jnp.zeros((in_dim, Gp), jnp.float32)
        for g in range(3):
            out = out.at[:, g * gate_stride:g * gate_stride + H].set(
                w_t[:, g * H:(g + 1) * H])
        return out.astype(compute_dtype)

    def resident(arr):
        # Full-array block, constant index map: fetched once, VMEM-resident.
        return pl.BlockSpec(arr.shape, lambda b: (0,) * arr.ndim)

    inputs = [x_tm]
    in_specs = [pl.BlockSpec((T, Bblk, F), lambda b: (0, b, 0))]

    in_dim = F
    for (w_ih, w_hh, b_ih, b_hh) in layers:
        b_ih = jnp.asarray(b_ih, jnp.float32)
        b_hh = jnp.asarray(b_hh, jnp.float32)
        w_ih_p = pack_gate_weight(w_ih, in_dim)
        w_hh_p = pack_gate_weight(w_hh, H)
        b_gi = jnp.zeros((1, Gp), jnp.float32)
        b_gi = b_gi.at[0, 0:H].set(b_ih[0:H] + b_hh[0:H])                              # r
        b_gi = b_gi.at[0, gate_stride:gate_stride + H].set(b_ih[H:2 * H] + b_hh[H:2 * H])  # z
        b_gi = b_gi.at[0, 2 * gate_stride:2 * gate_stride + H].set(b_ih[2 * H:3 * H])      # n
        b_hn = b_hh[2 * H:3 * H].reshape(1, H)
        for arr in (w_ih_p, w_hh_p, b_gi, b_hn):
            inputs.append(arr)
            in_specs.append(resident(arr))
        in_dim = H

    w_lin_p = jnp.asarray(lin_w, jnp.float32).T.astype(compute_dtype)   # (H, H)
    b_lin_p = jnp.asarray(lin_b, jnp.float32).reshape(1, H)
    for arr in (w_lin_p, b_lin_p):
        inputs.append(arr)
        in_specs.append(resident(arr))

    weight_bytes = sum(int(np.prod(a.shape)) * a.dtype.itemsize for a in inputs[1:])
    vmem_limit = int(min(64 * 2**20,
                         max(32 * 2**20, footprint(Bblk) + weight_bytes + 8 * 2**20)))

    out = pl.pallas_call(
        make_supervisor_kernel(L, T, Bblk, H, Gp, gate_stride, unroll=min(T, 8)),
        out_shape=jax.ShapeDtypeStruct((T, Bp, H), jnp.float32),
        grid=(nb,),
        in_specs=in_specs,
        out_specs=pl.BlockSpec((T, Bblk, H), lambda b: (0, b, 0)),
        scratch_shapes=[
            pltpu.VMEM((T * Bblk, Gp), compute_dtype),   # hoisted gi (current layer)
            pltpu.VMEM((T * Bblk, H), compute_dtype),    # layer output sequence
        ],
        compiler_params=pltpu.CompilerParams(
            dimension_semantics=("parallel",),           # batch blocks independent
            vmem_limit_bytes=vmem_limit),
    )(*inputs)

    out = out[:, :B, :]                                  # drop batch padding
    return jnp.transpose(out, (1, 0, 2))                 # (B, T, H)


def supervisor_reference(x_btf, layers, lin_w, lin_b):
    """Pure-JAX reference matching torch GRU + Linear + Sigmoid."""
    B, T, _ = x_btf.shape
    seq = x_btf.astype(jnp.float32)
    for (w_ih, w_hh, b_ih, b_hh) in layers:
        H = w_hh.shape[1]
        h = jnp.zeros((B, H), jnp.float32)
        outs = []
        for t in range(T):
            x_t = seq[:, t, :]
            gi = x_t @ w_ih.T + b_ih
            gh = h @ w_hh.T + b_hh
            r = jax.nn.sigmoid(gi[:, :H] + gh[:, :H])
            z = jax.nn.sigmoid(gi[:, H:2 * H] + gh[:, H:2 * H])
            n = jnp.tanh(gi[:, 2 * H:] + r * gh[:, 2 * H:])
            h = (1.0 - z) * n + z * h
            outs.append(h)
        seq = jnp.stack(outs, axis=1)
    return jax.nn.sigmoid(seq @ lin_w.T + lin_b)


if __name__ == "__main__":
    # Module config: module_name='gru', input_features=4, hidden_dim=32,
    # num_layers=3 -> GRU has num_layers-1 = 2 layers.
    B, T, F, H = 2, 8, 4, 32
    num_rnn_layers = 2

    key = jax.random.PRNGKey(0)
    scale = 1.0 / np.sqrt(H)

    layers = []
    in_dim = F
    for _ in range(num_rnn_layers):
        key, k1, k2, k3, k4 = jax.random.split(key, 5)
        w_ih = jax.random.uniform(k1, (3 * H, in_dim), jnp.float32, -scale, scale)
        w_hh = jax.random.uniform(k2, (3 * H, H), jnp.float32, -scale, scale)
        b_ih = jax.random.uniform(k3, (3 * H,), jnp.float32, -scale, scale)
        b_hh = jax.random.uniform(k4, (3 * H,), jnp.float32, -scale, scale)
        layers.append((w_ih, w_hh, b_ih, b_hh))
        in_dim = H

    key, k5, k6, kx = jax.random.split(key, 4)
    lin_w = jax.random.uniform(k5, (H, H), jnp.float32, -scale, scale)
    lin_b = jax.random.uniform(k6, (H,), jnp.float32, -scale, scale)
    x = jax.random.normal(kx, (B, T, F), jnp.float32)

    # 1) float32 path (single batch block): tight check vs PyTorch-GRU semantics.
    out_f32 = jax.block_until_ready(
        supervisor_forward(x, layers, lin_w, lin_b, compute_dtype=jnp.float32))
    ref = supervisor_reference(x, layers, lin_w, lin_b)
    assert out_f32.shape == (B, T, H), out_f32.shape
    np.testing.assert_allclose(np.asarray(out_f32), np.asarray(ref),
                               rtol=1e-5, atol=1e-5)

    # 2) bf16-MXU path with a multi-block batch grid (exercises pipelining and
    #    the parallel batch axis); tolerance relaxed for bf16 matmul operands.
    B2 = 40
    key, kx2 = jax.random.split(key)
    x2 = jax.random.normal(kx2, (B2, T, F), jnp.float32)
    out_bf16 = jax.block_until_ready(
        supervisor_forward(x2, layers, lin_w, lin_b,
                           compute_dtype=jnp.bfloat16, max_batch_block=16))
    ref2 = supervisor_reference(x2, layers, lin_w, lin_b)
    assert out_bf16.shape == (B2, T, H), out_bf16.shape
    np.testing.assert_allclose(np.asarray(out_bf16), np.asarray(ref2),
                               rtol=0, atol=3e-2)

    print("KERNEL_OK")
</pallas_src>

<mosaic_0001>
module attributes {stable_mosaic.version = 11 : i64} {
  func.func @kernel(%arg0: i32, %arg1: memref<8x8x4xf32, #tpu.memory_space<vmem>>, %arg2: memref<4x128xf32, #tpu.memory_space<vmem>>, %arg3: memref<32x128xf32, #tpu.memory_space<vmem>>, %arg4: memref<1x128xf32, #tpu.memory_space<vmem>>, %arg5: memref<1x32xf32, #tpu.memory_space<vmem>>, %arg6: memref<32x128xf32, #tpu.memory_space<vmem>>, %arg7: memref<32x128xf32, #tpu.memory_space<vmem>>, %arg8: memref<1x128xf32, #tpu.memory_space<vmem>>, %arg9: memref<1x32xf32, #tpu.memory_space<vmem>>, %arg10: memref<32x32xf32, #tpu.memory_space<vmem>>, %arg11: memref<1x32xf32, #tpu.memory_space<vmem>>, %arg12: memref<8x8x32xf32, #tpu.memory_space<vmem>>, %arg13: memref<64x128xf32, #tpu.memory_space<vmem>>, %arg14: memref<64x32xf32, #tpu.memory_space<vmem>>) attributes {dimension_semantics = [#tpu.dimension_semantics<parallel>], iteration_bounds = array<i64: 1>, scalar_prefetch = 0 : i64, scratch_operands = 2 : i64, tpu.core_type = #tpu.core_type<tc>, window_params = [{transform_indices = @transform_0, window_bounds = array<i64: 8, 8, 4>}, {pipeline_mode = #tpu.pipeline_mode<synchronous>, transform_indices = @transform_1, window_bounds = array<i64: 4, 128>}, {pipeline_mode = #tpu.pipeline_mode<synchronous>, transform_indices = @transform_2, window_bounds = array<i64: 32, 128>}, {pipeline_mode = #tpu.pipeline_mode<synchronous>, transform_indices = @transform_3, window_bounds = array<i64: 1, 128>}, {pipeline_mode = #tpu.pipeline_mode<synchronous>, transform_indices = @transform_4, window_bounds = array<i64: 1, 32>}, {pipeline_mode = #tpu.pipeline_mode<synchronous>, transform_indices = @transform_5, window_bounds = array<i64: 32, 128>}, {pipeline_mode = #tpu.pipeline_mode<synchronous>, transform_indices = @transform_6, window_bounds = array<i64: 32, 128>}, {pipeline_mode = #tpu.pipeline_mode<synchronous>, transform_indices = @transform_7, window_bounds = array<i64: 1, 128>}, {pipeline_mode = #tpu.pipeline_mode<synchronous>, transform_indices = @transform_8, window_bounds = array<i64: 1, 32>}, {pipeline_mode = #tpu.pipeline_mode<synchronous>, transform_indices = @transform_9, window_bounds = array<i64: 32, 32>}, {pipeline_mode = #tpu.pipeline_mode<synchronous>, transform_indices = @transform_10, window_bounds = array<i64: 1, 32>}, {transform_indices = @transform_11, window_bounds = array<i64: 8, 8, 32>}]} {
    %c0 = arith.constant 0 : index
    %c0_0 = arith.constant 0 : index
    %0 = vector.load %arg2[%c0, %c0_0] : memref<4x128xf32, #tpu.memory_space<vmem>>, vector<4x128xf32>
    %c0_1 = arith.constant 0 : index
    %c0_2 = arith.constant 0 : index
    %1 = vector.load %arg3[%c0_1, %c0_2] : memref<32x128xf32, #tpu.memory_space<vmem>>, vector<32x128xf32>
    %c0_3 = arith.constant 0 : index
    %c0_4 = arith.constant 0 : index
    %2 = vector.load %arg4[%c0_3, %c0_4] : memref<1x128xf32, #tpu.memory_space<vmem>>, vector<1x128xf32>
    %c0_5 = arith.constant 0 : index
    %c0_6 = arith.constant 0 : index
    %3 = vector.load %arg5[%c0_5, %c0_6] : memref<1x32xf32, #tpu.memory_space<vmem>>, vector<1x32xf32>
    %c0_7 = arith.constant 0 : index
    %c0_8 = arith.constant 0 : index
    %c0_9 = arith.constant 0 : index
    %4 = vector.load %arg1[%c0_7, %c0_8, %c0_9] : memref<8x8x4xf32, #tpu.memory_space<vmem>>, vector<8x8x4xf32>
    %5 = vector.shape_cast %4 : vector<8x8x4xf32> to vector<64x4xf32>
    %cst = arith.constant dense<0.000000e+00> : vector<64x128xf32>
    %6 = tpu.matmul %5, %0, %cst {dimension_numbers = #tpu.dot_dimension_numbers<[1], [0], [0], [1], [0, 0, 1, 1], [], []>} : vector<64x4xf32>, vector<4x128xf32>, vector<64x128xf32> -> vector<64x128xf32>
    %7 = vector.broadcast %2 : vector<1x128xf32> to vector<64x128xf32>
    %8 = arith.addf %6, %7 : vector<64x128xf32>
    %c0_10 = arith.constant 0 : index
    %c0_11 = arith.constant 0 : index
    %9 = vector.load %arg13[%c0_10, %c0_11] : memref<64x128xf32, #tpu.memory_space<vmem>>, vector<64x128xf32>
    tpu.vector_store %arg13[%c0_10, %c0_11], %8 {strides = array<i32>} : memref<64x128xf32, #tpu.memory_space<vmem>>, vector<64x128xf32>,
    %10 = vector.shape_cast %3 : vector<1x32xf32> to vector<1x32xf32>
    %11 = vector.broadcast %10 : vector<1x32xf32> to vector<8x32xf32>
    %cst_12 = arith.constant 0.000000e+00 : f32
    %12 = vector.broadcast %cst_12 : f32 to vector<8x32xf32>
    %c0_i32 = arith.constant 0 : i32
    %c8_i32 = arith.constant 8 : i32
    %13 = arith.muli %c0_i32, %c8_i32 : i32
    %14 = tpu.assume_multiple %13, 8 : i32
    %15 = arith.index_cast %14 : i32 to index
    %c0_13 = arith.constant 0 : index
    %16 = vector.load %arg13[%15, %c0_13] : memref<64x128xf32, #tpu.memory_space<vmem>>, vector<8x128xf32>
    %cst_14 = arith.constant dense<0.000000e+00> : vector<8x128xf32>
    %17 = tpu.matmul %12, %1, %cst_14 {dimension_numbers = #tpu.dot_dimension_numbers<[1], [0], [0], [1], [0, 0, 1, 1], [], []>} : vector<8x32xf32>, vector<32x128xf32>, vector<8x128xf32> -> vector<8x128xf32>
    %18 = arith.addf %16, %17 : vector<8x128xf32>
    %19 = arith.negf %18 : vector<8x128xf32>
    %20 = math.exp %19 : vector<8x128xf32>
    %cst_15 = arith.constant 1.000000e+00 : f32
    %21 = vector.broadcast %cst_15 : f32 to vector<8x128xf32>
    %22 = arith.addf %21, %20 : vector<8x128xf32>
    %23 = arith.divf %21, %22 : vector<8x128xf32>
    %24 = vector.extract_strided_slice %23 {offsets = [0, 0], sizes = [8, 32], strides = [1, 1]} : vector<8x128xf32> to vector<8x32xf32>
    %25 = vector.extract_strided_slice %23 {offsets = [0, 32], sizes = [8, 32], strides = [1, 1]} : vector<8x128xf32> to vector<8x32xf32>
    %26 = vector.extract_strided_slice %16 {offsets = [0, 64], sizes = [8, 32], strides = [1, 1]} : vector<8x128xf32> to vector<8x32xf32>
    %27 = vector.extract_strided_slice %17 {offsets = [0, 64], sizes = [8, 32], strides = [1, 1]} : vector<8x128xf32> to vector<8x32xf32>
    %28 = arith.addf %27, %11 : vector<8x32xf32>
    %29 = arith.mulf %24, %28 : vector<8x32xf32>
    %30 = arith.addf %26, %29 : vector<8x32xf32>
    %31 = math.tanh %30 : vector<8x32xf32>
    %32 = arith.subf %12, %31 : vector<8x32xf32>
    %33 = arith.mulf %25, %32 : vector<8x32xf32>
    %34 = arith.addf %31, %33 : vector<8x32xf32>
    %35 = arith.index_cast %14 : i32 to index
    %c0_16 = arith.constant 0 : index
    %36 = vector.load %arg14[%35, %c0_16] : memref<64x32xf32, #tpu.memory_space<vmem>>, vector<8x32xf32>
    tpu.vector_store %arg14[%35, %c0_16], %34 {strides = array<i32>} : memref<64x32xf32, #tpu.memory_space<vmem>>, vector<8x32xf32>,
    %c1_i32 = arith.constant 1 : i32
    %c8_i32_17 = arith.constant 8 : i32
    %37 = arith.muli %c1_i32, %c8_i32_17 : i32
    %38 = tpu.assume_multiple %37, 8 : i32
    %39 = arith.index_cast %38 : i32 to index
    %c0_18 = arith.constant 0 : index
    %40 = vector.load %arg13[%39, %c0_18] : memref<64x128xf32, #tpu.memory_space<vmem>>, vector<8x128xf32>
    %cst_19 = arith.constant dense<0.000000e+00> : vector<8x128xf32>
    %41 = tpu.matmul %34, %1, %cst_19 {dimension_numbers = #tpu.dot_dimension_numbers<[1], [0], [0], [1], [0, 0, 1, 1], [], []>} : vector<8x32xf32>, vector<32x128xf32>, vector<8x128xf32> -> vector<8x128xf32>
    %42 = arith.addf %40, %41 : vector<8x128xf32>
    %43 = arith.negf %42 : vector<8x128xf32>
    %44 = math.exp %43 : vector<8x128xf32>
    %cst_20 = arith.constant 1.000000e+00 : f32
    %45 = vector.broadcast %cst_20 : f32 to vector<8x128xf32>
    %46 = arith.addf %45, %44 : vector<8x128xf32>
    %47 = arith.divf %45, %46 : vector<8x128xf32>
    %48 = vector.extract_strided_slice %47 {offsets = [0, 0], sizes = [8, 32], strides = [1, 1]} : vector<8x128xf32> to vector<8x32xf32>
    %49 = vector.extract_strided_slice %47 {offsets = [0, 32], sizes = [8, 32], strides = [1, 1]} : vector<8x128xf32> to vector<8x32xf32>
    %50 = vector.extract_strided_slice %40 {offsets = [0, 64], sizes = [8, 32], strides = [1, 1]} : vector<8x128xf32> to vector<8x32xf32>
    %51 = vector.extract_strided_slice %41 {offsets = [0, 64], sizes = [8, 32], strides = [1, 1]} : vector<8x128xf32> to vector<8x32xf32>
    %52 = arith.addf %51, %11 : vector<8x32xf32>
    %53 = arith.mulf %48, %52 : vector<8x32xf32>
    %54 = arith.addf %50, %53 : vector<8x32xf32>
    %55 = math.tanh %54 : vector<8x32xf32>
    %56 = arith.subf %34, %55 : vector<8x32xf32>
    %57 = arith.mulf %49, %56 : vector<8x32xf32>
    %58 = arith.addf %55, %57 : vector<8x32xf32>
    %59 = arith.index_cast %38 : i32 to index
    %c0_21 = arith.constant 0 : index
    %60 = vector.load %arg14[%59, %c0_21] : memref<64x32xf32, #tpu.memory_space<vmem>>, vector<8x32xf32>
    tpu.vector_store %arg14[%59, %c0_21], %58 {strides = array<i32>} : memref<64x32xf32, #tpu.memory_space<vmem>>, vector<8x32xf32>,
    %c2_i32 = arith.constant 2 : i32
    %c8_i32_22 = arith.constant 8 : i32
    %61 = arith.muli %c2_i32, %c8_i32_22 : i32
    %62 = tpu.assume_multiple %61, 8 : i32
    %63 = arith.index_cast %62 : i32 to index
    %c0_23 = arith.constant 0 : index
    %64 = vector.load %arg13[%63, %c0_23] : memref<64x128xf32, #tpu.memory_space<vmem>>, vector<8x128xf32>
    %cst_24 = arith.constant dense<0.000000e+00> : vector<8x128xf32>
    %65 = tpu.matmul %58, %1, %cst_24 {dimension_numbers = #tpu.dot_dimension_numbers<[1], [0], [0], [1], [0, 0, 1, 1], [], []>} : vector<8x32xf32>, vector<32x128xf32>, vector<8x128xf32> -> vector<8x128xf32>
    %66 = arith.addf %64, %65 : vector<8x128xf32>
    %67 = arith.negf %66 : vector<8x128xf32>
    %68 = math.exp %67 : vector<8x128xf32>
    %cst_25 = arith.constant 1.000000e+00 : f32
    %69 = vector.broadcast %cst_25 : f32 to vector<8x128xf32>
    %70 = arith.addf %69, %68 : vector<8x128xf32>
    %71 = arith.divf %69, %70 : vector<8x128xf32>
    %72 = vector.extract_strided_slice %71 {offsets = [0, 0], sizes = [8, 32], strides = [1, 1]} : vector<8x128xf32> to vector<8x32xf32>
    %73 = vector.extract_strided_slice %71 {offsets = [0, 32], sizes = [8, 32], strides = [1, 1]} : vector<8x128xf32> to vector<8x32xf32>
    %74 = vector.extract_strided_slice %64 {offsets = [0, 64], sizes = [8, 32], strides = [1, 1]} : vector<8x128xf32> to vector<8x32xf32>
    %75 = vector.extract_strided_slice %65 {offsets = [0, 64], sizes = [8, 32], strides = [1, 1]} : vector<8x128xf32> to vector<8x32xf32>
    %76 = arith.addf %75, %11 : vector<8x32xf32>
    %77 = arith.mulf %72, %76 : vector<8x32xf32>
    %78 = arith.addf %74, %77 : vector<8x32xf32>
    %79 = math.tanh %78 : vector<8x32xf32>
    %80 = arith.subf %58, %79 : vector<8x32xf32>
    %81 = arith.mulf %73, %80 : vector<8x32xf32>
    %82 = arith.addf %79, %81 : vector<8x32xf32>
    %83 = arith.index_cast %62 : i32 to index
    %c0_26 = arith.constant 0 : index
    %84 = vector.load %arg14[%83, %c0_26] : memref<64x32xf32, #tpu.memory_space<vmem>>, vector<8x32xf32>
    tpu.vector_store %arg14[%83, %c0_26], %82 {strides = array<i32>} : memref<64x32xf32, #tpu.memory_space<vmem>>, vector<8x32xf32>,
    %c3_i32 = arith.constant 3 : i32
    %c8_i32_27 = arith.constant 8 : i32
    %85 = arith.muli %c3_i32, %c8_i32_27 : i32
    %86 = tpu.assume_multiple %85, 8 : i32
    %87 = arith.index_cast %86 : i32 to index
    %c0_28 = arith.constant 0 : index
    %88 = vector.load %arg13[%87, %c0_28] : memref<64x128xf32, #tpu.memory_space<vmem>>, vector<8x128xf32>
    %cst_29 = arith.constant dense<0.000000e+00> : vector<8x128xf32>
    %89 = tpu.matmul %82, %1, %cst_29 {dimension_numbers = #tpu.dot_dimension_numbers<[1], [0], [0], [1], [0, 0, 1, 1], [], []>} : vector<8x32xf32>, vector<32x128xf32>, vector<8x128xf32> -> vector<8x128xf32>
    %90 = arith.addf %88, %89 : vector<8x128xf32>
    %91 = arith.negf %90 : vector<8x128xf32>
    %92 = math.exp %91 : vector<8x128xf32>
    %cst_30 = arith.constant 1.000000e+00 : f32
    %93 = vector.broadcast %cst_30 : f32 to vector<8x128xf32>
    %94 = arith.addf %93, %92 : vector<8x128xf32>
    %95 = arith.divf %93, %94 : vector<8x128xf32>
    %96 = vector.extract_strided_slice %95 {offsets = [0, 0], sizes = [8, 32], strides = [1, 1]} : vector<8x128xf32> to vector<8x32xf32>
    %97 = vector.extract_strided_slice %95 {offsets = [0, 32], sizes = [8, 32], strides = [1, 1]} : vector<8x128xf32> to vector<8x32xf32>
    %98 = vector.extract_strided_slice %88 {offsets = [0, 64], sizes = [8, 32], strides = [1, 1]} : vector<8x128xf32> to vector<8x32xf32>
    %99 = vector.extract_strided_slice %89 {offsets = [0, 64], sizes = [8, 32], strides = [1, 1]} : vector<8x128xf32> to vector<8x32xf32>
    %100 = arith.addf %99, %11 : vector<8x32xf32>
    %101 = arith.mulf %96, %100 : vector<8x32xf32>
    %102 = arith.addf %98, %101 : vector<8x32xf32>
    %103 = math.tanh %102 : vector<8x32xf32>
    %104 = arith.subf %82, %103 : vector<8x32xf32>
    %105 = arith.mulf %97, %104 : vector<8x32xf32>
    %106 = arith.addf %103, %105 : vector<8x32xf32>
    %107 = arith.index_cast %86 : i32 to index
    %c0_31 = arith.constant 0 : index
    %108 = vector.load %arg14[%107, %c0_31] : memref<64x32xf32, #tpu.memory_space<vmem>>, vector<8x32xf32>
    tpu.vector_store %arg14[%107, %c0_31], %106 {strides = array<i32>} : memref<64x32xf32, #tpu.memory_space<vmem>>, vector<8x32xf32>,
    %c4_i32 = arith.constant 4 : i32
    %c8_i32_32 = arith.constant 8 : i32
    %109 = arith.muli %c4_i32, %c8_i32_32 : i32
    %110 = tpu.assume_multiple %109, 8 : i32
    %111 = arith.index_cast %110 : i32 to index
    %c0_33 = arith.constant 0 : index
    %112 = vector.load %arg13[%111, %c0_33] : memref<64x128xf32, #tpu.memory_space<vmem>>, vector<8x128xf32>
    %cst_34 = arith.constant dense<0.000000e+00> : vector<8x128xf32>
    %113 = tpu.matmul %106, %1, %cst_34 {dimension_numbers = #tpu.dot_dimension_numbers<[1], [0], [0], [1], [0, 0, 1, 1], [], []>} : vector<8x32xf32>, vector<32x128xf32>, vector<8x128xf32> -> vector<8x128xf32>
    %114 = arith.addf %112, %113 : vector<8x128xf32>
    %115 = arith.negf %114 : vector<8x128xf32>
    %116 = math.exp %115 : vector<8x128xf32>
    %cst_35 = arith.constant 1.000000e+00 : f32
    %117 = vector.broadcast %cst_35 : f32 to vector<8x128xf32>
    %118 = arith.addf %117, %116 : vector<8x128xf32>
    %119 = arith.divf %117, %118 : vector<8x128xf32>
    %120 = vector.extract_strided_slice %119 {offsets = [0, 0], sizes = [8, 32], strides = [1, 1]} : vector<8x128xf32> to vector<8x32xf32>
    %121 = vector.extract_strided_slice %119 {offsets = [0, 32], sizes = [8, 32], strides = [1, 1]} : vector<8x128xf32> to vector<8x32xf32>
    %122 = vector.extract_strided_slice %112 {offsets = [0, 64], sizes = [8, 32], strides = [1, 1]} : vector<8x128xf32> to vector<8x32xf32>
    %123 = vector.extract_strided_slice %113 {offsets = [0, 64], sizes = [8, 32], strides = [1, 1]} : vector<8x128xf32> to vector<8x32xf32>
    %124 = arith.addf %123, %11 : vector<8x32xf32>
    %125 = arith.mulf %120, %124 : vector<8x32xf32>
    %126 = arith.addf %122, %125 : vector<8x32xf32>
    %127 = math.tanh %126 : vector<8x32xf32>
    %128 = arith.subf %106, %127 : vector<8x32xf32>
    %129 = arith.mulf %121, %128 : vector<8x32xf32>
    %130 = arith.addf %127, %129 : vector<8x32xf32>
    %131 = arith.index_cast %110 : i32 to index
    %c0_36 = arith.constant 0 : index
    %132 = vector.load %arg14[%131, %c0_36] : memref<64x32xf32, #tpu.memory_space<vmem>>, vector<8x32xf32>
    tpu.vector_store %arg14[%131, %c0_36], %130 {strides = array<i32>} : memref<64x32xf32, #tpu.memory_space<vmem>>, vector<8x32xf32>,
    %c5_i32 = arith.constant 5 : i32
    %c8_i32_37 = arith.constant 8 : i32
    %133 = arith.muli %c5_i32, %c8_i32_37 : i32
    %134 = tpu.assume_multiple %133, 8 : i32
    %135 = arith.index_cast %134 : i32 to index
    %c0_38 = arith.constant 0 : index
    %136 = vector.load %arg13[%135, %c0_38] : memref<64x128xf32, #tpu.memory_space<vmem>>, vector<8x128xf32>
    %cst_39 = arith.constant dense<0.000000e+00> : vector<8x128xf32>
    %137 = tpu.matmul %130, %1, %cst_39 {dimension_numbers = #tpu.dot_dimension_numbers<[1], [0], [0], [1], [0, 0, 1, 1], [], []>} : vector<8x32xf32>, vector<32x128xf32>, vector<8x128xf32> -> vector<8x128xf32>
    %138 = arith.addf %136, %137 : vector<8x128xf32>
    %139 = arith.negf %138 : vector<8x128xf32>
    %140 = math.exp %139 : vector<8x128xf32>
    %cst_40 = arith.constant 1.000000e+00 : f32
    %141 = vector.broadcast %cst_40 : f32 to vector<8x128xf32>
    %142 = arith.addf %141, %140 : vector<8x128xf32>
    %143 = arith.divf %141, %142 : vector<8x128xf32>
    %144 = vector.extract_strided_slice %143 {offsets = [0, 0], sizes = [8, 32], strides = [1, 1]} : vector<8x128xf32> to vector<8x32xf32>
    %145 = vector.extract_strided_slice %143 {offsets = [0, 32], sizes = [8, 32], strides = [1, 1]} : vector<8x128xf32> to vector<8x32xf32>
    %146 = vector.extract_strided_slice %136 {offsets = [0, 64], sizes = [8, 32], strides = [1, 1]} : vector<8x128xf32> to vector<8x32xf32>
    %147 = vector.extract_strided_slice %137 {offsets = [0, 64], sizes = [8, 32], strides = [1, 1]} : vector<8x128xf32> to vector<8x32xf32>
    %148 = arith.addf %147, %11 : vector<8x32xf32>
    %149 = arith.mulf %144, %148 : vector<8x32xf32>
    %150 = arith.addf %146, %149 : vector<8x32xf32>
    %151 = math.tanh %150 : vector<8x32xf32>
    %152 = arith.subf %130, %151 : vector<8x32xf32>
    %153 = arith.mulf %145, %152 : vector<8x32xf32>
    %154 = arith.addf %151, %153 : vector<8x32xf32>
    %155 = arith.index_cast %134 : i32 to index
    %c0_41 = arith.constant 0 : index
    %156 = vector.load %arg14[%155, %c0_41] : memref<64x32xf32, #tpu.memory_space<vmem>>, vector<8x32xf32>
    tpu.vector_store %arg14[%155, %c0_41], %154 {strides = array<i32>} : memref<64x32xf32, #tpu.memory_space<vmem>>, vector<8x32xf32>,
    %c6_i32 = arith.constant 6 : i32
    %c8_i32_42 = arith.constant 8 : i32
    %157 = arith.muli %c6_i32, %c8_i32_42 : i32
    %158 = tpu.assume_multiple %157, 8 : i32
    %159 = arith.index_cast %158 : i32 to index
    %c0_43 = arith.constant 0 : index
    %160 = vector.load %arg13[%159, %c0_43] : memref<64x128xf32, #tpu.memory_space<vmem>>, vector<8x128xf32>
    %cst_44 = arith.constant dense<0.000000e+00> : vector<8x128xf32>
    %161 = tpu.matmul %154, %1, %cst_44 {dimension_numbers = #tpu.dot_dimension_numbers<[1], [0], [0], [1], [0, 0, 1, 1], [], []>} : vector<8x32xf32>, vector<32x128xf32>, vector<8x128xf32> -> vector<8x128xf32>
    %162 = arith.addf %160, %161 : vector<8x128xf32>
    %163 = arith.negf %162 : vector<8x128xf32>
    %164 = math.exp %163 : vector<8x128xf32>
    %cst_45 = arith.constant 1.000000e+00 : f32
    %165 = vector.broadcast %cst_45 : f32 to vector<8x128xf32>
    %166 = arith.addf %165, %164 : vector<8x128xf32>
    %167 = arith.divf %165, %166 : vector<8x128xf32>
    %168 = vector.extract_strided_slice %167 {offsets = [0, 0], sizes = [8, 32], strides = [1, 1]} : vector<8x128xf32> to vector<8x32xf32>
    %169 = vector.extract_strided_slice %167 {offsets = [0, 32], sizes = [8, 32], strides = [1, 1]} : vector<8x128xf32> to vector<8x32xf32>
    %170 = vector.extract_strided_slice %160 {offsets = [0, 64], sizes = [8, 32], strides = [1, 1]} : vector<8x128xf32> to vector<8x32xf32>
    %171 = vector.extract_strided_slice %161 {offsets = [0, 64], sizes = [8, 32], strides = [1, 1]} : vector<8x128xf32> to vector<8x32xf32>
    %172 = arith.addf %171, %11 : vector<8x32xf32>
    %173 = arith.mulf %168, %172 : vector<8x32xf32>
    %174 = arith.addf %170, %173 : vector<8x32xf32>
    %175 = math.tanh %174 : vector<8x32xf32>
    %176 = arith.subf %154, %175 : vector<8x32xf32>
    %177 = arith.mulf %169, %176 : vector<8x32xf32>
    %178 = arith.addf %175, %177 : vector<8x32xf32>
    %179 = arith.index_cast %158 : i32 to index
    %c0_46 = arith.constant 0 : index
    %180 = vector.load %arg14[%179, %c0_46] : memref<64x32xf32, #tpu.memory_space<vmem>>, vector<8x32xf32>
    tpu.vector_store %arg14[%179, %c0_46], %178 {strides = array<i32>} : memref<64x32xf32, #tpu.memory_space<vmem>>, vector<8x32xf32>,
    %c7_i32 = arith.constant 7 : i32
    %c8_i32_47 = arith.constant 8 : i32
    %181 = arith.muli %c7_i32, %c8_i32_47 : i32
    %182 = tpu.assume_multiple %181, 8 : i32
    %183 = arith.index_cast %182 : i32 to index
    %c0_48 = arith.constant 0 : index
    %184 = vector.load %arg13[%183, %c0_48] : memref<64x128xf32, #tpu.memory_space<vmem>>, vector<8x128xf32>
    %cst_49 = arith.constant dense<0.000000e+00> : vector<8x128xf32>
    %185 = tpu.matmul %178, %1, %cst_49 {dimension_numbers = #tpu.dot_dimension_numbers<[1], [0], [0], [1], [0, 0, 1, 1], [], []>} : vector<8x32xf32>, vector<32x128xf32>, vector<8x128xf32> -> vector<8x128xf32>
    %186 = arith.addf %184, %185 : vector<8x128xf32>
    %187 = arith.negf %186 : vector<8x128xf32>
    %188 = math.exp %187 : vector<8x128xf32>
    %cst_50 = arith.constant 1.000000e+00 : f32
    %189 = vector.broadcast %cst_50 : f32 to vector<8x128xf32>
    %190 = arith.addf %189, %188 : vector<8x128xf32>
    %191 = arith.divf %189, %190 : vector<8x128xf32>
    %192 = vector.extract_strided_slice %191 {offsets = [0, 0], sizes = [8, 32], strides = [1, 1]} : vector<8x128xf32> to vector<8x32xf32>
    %193 = vector.extract_strided_slice %191 {offsets = [0, 32], sizes = [8, 32], strides = [1, 1]} : vector<8x128xf32> to vector<8x32xf32>
    %194 = vector.extract_strided_slice %184 {offsets = [0, 64], sizes = [8, 32], strides = [1, 1]} : vector<8x128xf32> to vector<8x32xf32>
    %195 = vector.extract_strided_slice %185 {offsets = [0, 64], sizes = [8, 32], strides = [1, 1]} : vector<8x128xf32> to vector<8x32xf32>
    %196 = arith.addf %195, %11 : vector<8x32xf32>
    %197 = arith.mulf %192, %196 : vector<8x32xf32>
    %198 = arith.addf %194, %197 : vector<8x32xf32>
    %199 = math.tanh %198 : vector<8x32xf32>
    %200 = arith.subf %178, %199 : vector<8x32xf32>
    %201 = arith.mulf %193, %200 : vector<8x32xf32>
    %202 = arith.addf %199, %201 : vector<8x32xf32>
    %203 = arith.index_cast %182 : i32 to index
    %c0_51 = arith.constant 0 : index
    %204 = vector.load %arg14[%203, %c0_51] : memref<64x32xf32, #tpu.memory_space<vmem>>, vector<8x32xf32>
    tpu.vector_store %arg14[%203, %c0_51], %202 {strides = array<i32>} : memref<64x32xf32, #tpu.memory_space<vmem>>, vector<8x32xf32>,
    %c8_i32_52 = arith.constant 8 : i32
    %c0_53 = arith.constant 0 : index
    %c0_54 = arith.constant 0 : index
    %205 = vector.load %arg6[%c0_53, %c0_54] : memref<32x128xf32, #tpu.memory_space<vmem>>, vector<32x128xf32>
    %c0_55 = arith.constant 0 : index
    %c0_56 = arith.constant 0 : index
    %206 = vector.load %arg7[%c0_55, %c0_56] : memref<32x128xf32, #tpu.memory_space<vmem>>, vector<32x128xf32>
    %c0_57 = arith.constant 0 : index
    %c0_58 = arith.constant 0 : index
    %207 = vector.load %arg8[%c0_57, %c0_58] : memref<1x128xf32, #tpu.memory_space<vmem>>, vector<1x128xf32>
    %c0_59 = arith.constant 0 : index
    %c0_60 = arith.constant 0 : index
    %208 = vector.load %arg9[%c0_59, %c0_60] : memref<1x32xf32, #tpu.memory_space<vmem>>, vector<1x32xf32>
    %c0_61 = arith.constant 0 : index
    %c0_62 = arith.constant 0 : index
    %209 = vector.load %arg14[%c0_61, %c0_62] : memref<64x32xf32, #tpu.memory_space<vmem>>, vector<64x32xf32>
    %cst_63 = arith.constant dense<0.000000e+00> : vector<64x128xf32>
    %210 = tpu.matmul %209, %205, %cst_63 {dimension_numbers = #tpu.dot_dimension_numbers<[1], [0], [0], [1], [0, 0, 1, 1], [], []>} : vector<64x32xf32>, vector<32x128xf32>, vector<64x128xf32> -> vector<64x128xf32>
    %211 = vector.broadcast %207 : vector<1x128xf32> to vector<64x128xf32>
    %212 = arith.addf %210, %211 : vector<64x128xf32>
    %c0_64 = arith.constant 0 : index
    %c0_65 = arith.constant 0 : index
    %213 = vector.load %arg13[%c0_64, %c0_65] : memref<64x128xf32, #tpu.memory_space<vmem>>, vector<64x128xf32>
    tpu.vector_store %arg13[%c0_64, %c0_65], %212 {strides = array<i32>} : memref<64x128xf32, #tpu.memory_space<vmem>>, vector<64x128xf32>,
    %214 = vector.shape_cast %208 : vector<1x32xf32> to vector<1x32xf32>
    %215 = vector.broadcast %214 : vector<1x32xf32> to vector<8x32xf32>
    %cst_66 = arith.constant 0.000000e+00 : f32
    %216 = vector.broadcast %cst_66 : f32 to vector<8x32xf32>
    %c0_i32_67 = arith.constant 0 : i32
    %c8_i32_68 = arith.constant 8 : i32
    %217 = arith.muli %c0_i32_67, %c8_i32_68 : i32
    %218 = tpu.assume_multiple %217, 8 : i32
    %219 = arith.index_cast %218 : i32 to index
    %c0_69 = arith.constant 0 : index
    %220 = vector.load %arg13[%219, %c0_69] : memref<64x128xf32, #tpu.memory_space<vmem>>, vector<8x128xf32>
    %cst_70 = arith.constant dense<0.000000e+00> : vector<8x128xf32>
    %221 = tpu.matmul %216, %206, %cst_70 {dimension_numbers = #tpu.dot_dimension_numbers<[1], [0], [0], [1], [0, 0, 1, 1], [], []>} : vector<8x32xf32>, vector<32x128xf32>, vector<8x128xf32> -> vector<8x128xf32>
    %222 = arith.addf %220, %221 : vector<8x128xf32>
    %223 = arith.negf %222 : vector<8x128xf32>
    %224 = math.exp %223 : vector<8x128xf32>
    %cst_71 = arith.constant 1.000000e+00 : f32
    %225 = vector.broadcast %cst_71 : f32 to vector<8x128xf32>
    %226 = arith.addf %225, %224 : vector<8x128xf32>
    %227 = arith.divf %225, %226 : vector<8x128xf32>
    %228 = vector.extract_strided_slice %227 {offsets = [0, 0], sizes = [8, 32], strides = [1, 1]} : vector<8x128xf32> to vector<8x32xf32>
    %229 = vector.extract_strided_slice %227 {offsets = [0, 32], sizes = [8, 32], strides = [1, 1]} : vector<8x128xf32> to vector<8x32xf32>
    %230 = vector.extract_strided_slice %220 {offsets = [0, 64], sizes = [8, 32], strides = [1, 1]} : vector<8x128xf32> to vector<8x32xf32>
    %231 = vector.extract_strided_slice %221 {offsets = [0, 64], sizes = [8, 32], strides = [1, 1]} : vector<8x128xf32> to vector<8x32xf32>
    %232 = arith.addf %231, %215 : vector<8x32xf32>
    %233 = arith.mulf %228, %232 : vector<8x32xf32>
    %234 = arith.addf %230, %233 : vector<8x32xf32>
    %235 = math.tanh %234 : vector<8x32xf32>
    %236 = arith.subf %216, %235 : vector<8x32xf32>
    %237 = arith.mulf %229, %236 : vector<8x32xf32>
    %238 = arith.addf %235, %237 : vector<8x32xf32>
    %239 = arith.index_cast %218 : i32 to index
    %c0_72 = arith.constant 0 : index
    %240 = vector.load %arg14[%239, %c0_72] : memref<64x32xf32, #tpu.memory_space<vmem>>, vector<8x32xf32>
    tpu.vector_store %arg14[%239, %c0_72], %238 {strides = array<i32>} : memref<64x32xf32, #tpu.memory_space<vmem>>, vector<8x32xf32>,
    %c1_i32_73 = arith.constant 1 : i32
    %c8_i32_74 = arith.constant 8 : i32
    %241 = arith.muli %c1_i32_73, %c8_i32_74 : i32
    %242 = tpu.assume_multiple %241, 8 : i32
    %243 = arith.index_cast %242 : i32 to index
    %c0_75 = arith.constant 0 : index
    %244 = vector.load %arg13[%243, %c0_75] : memref<64x128xf32, #tpu.memory_space<vmem>>, vector<8x128xf32>
    %cst_76 = arith.constant dense<0.000000e+00> : vector<8x128xf32>
    %245 = tpu.matmul %238, %206, %cst_76 {dimension_numbers = #tpu.dot_dimension_numbers<[1], [0], [0], [1], [0, 0, 1, 1], [], []>} : vector<8x32xf32>, vector<32x128xf32>, vector<8x128xf32> -> vector<8x128xf32>
    %246 = arith.addf %244, %245 : vector<8x128xf32>
    %247 = arith.negf %246 : vector<8x128xf32>
    %248 = math.exp %247 : vector<8x128xf32>
    %cst_77 = arith.constant 1.000000e+00 : f32
    %249 = vector.broadcast %cst_77 : f32 to vector<8x128xf32>
    %250 = arith.addf %249, %248 : vector<8x128xf32>
    %251 = arith.divf %249, %250 : vector<8x128xf32>
    %252 = vector.extract_strided_slice %251 {offsets = [0, 0], sizes = [8, 32], strides = [1, 1]} : vector<8x128xf32> to vector<8x32xf32>
    %253 = vector.extract_strided_slice %251 {offsets = [0, 32], sizes = [8, 32], strides = [1, 1]} : vector<8x128xf32> to vector<8x32xf32>
    %254 = vector.extract_strided_slice %244 {offsets = [0, 64], sizes = [8, 32], strides = [1, 1]} : vector<8x128xf32> to vector<8x32xf32>
    %255 = vector.extract_strided_slice %245 {offsets = [0, 64], sizes = [8, 32], strides = [1, 1]} : vector<8x128xf32> to vector<8x32xf32>
    %256 = arith.addf %255, %215 : vector<8x32xf32>
    %257 = arith.mulf %252, %256 : vector<8x32xf32>
    %258 = arith.addf %254, %257 : vector<8x32xf32>
    %259 = math.tanh %258 : vector<8x32xf32>
    %260 = arith.subf %238, %259 : vector<8x32xf32>
    %261 = arith.mulf %253, %260 : vector<8x32xf32>
    %262 = arith.addf %259, %261 : vector<8x32xf32>
    %263 = arith.index_cast %242 : i32 to index
    %c0_78 = arith.constant 0 : index
    %264 = vector.load %arg14[%263, %c0_78] : memref<64x32xf32, #tpu.memory_space<vmem>>, vector<8x32xf32>
    tpu.vector_store %arg14[%263, %c0_78], %262 {strides = array<i32>} : memref<64x32xf32, #tpu.memory_space<vmem>>, vector<8x32xf32>,
    %c2_i32_79 = arith.constant 2 : i32
    %c8_i32_80 = arith.constant 8 : i32
    %265 = arith.muli %c2_i32_79, %c8_i32_80 : i32
    %266 = tpu.assume_multiple %265, 8 : i32
    %267 = arith.index_cast %266 : i32 to index
    %c0_81 = arith.constant 0 : index
    %268 = vector.load %arg13[%267, %c0_81] : memref<64x128xf32, #tpu.memory_space<vmem>>, vector<8x128xf32>
    %cst_82 = arith.constant dense<0.000000e+00> : vector<8x128xf32>
    %269 = tpu.matmul %262, %206, %cst_82 {dimension_numbers = #tpu.dot_dimension_numbers<[1], [0], [0], [1], [0, 0, 1, 1], [], []>} : vector<8x32xf32>, vector<32x128xf32>, vector<8x128xf32> -> vector<8x128xf32>
    %270 = arith.addf %268, %269 : vector<8x128xf32>
    %271 = arith.negf %270 : vector<8x128xf32>
    %272 = math.exp %271 : vector<8x128xf32>
    %cst_83 = arith.constant 1.000000e+00 : f32
    %273 = vector.broadcast %cst_83 : f32 to vector<8x128xf32>
    %274 = arith.addf %273, %272 : vector<8x128xf32>
    %275 = arith.divf %273, %274 : vector<8x128xf32>
    %276 = vector.extract_strided_slice %275 {offsets = [0, 0], sizes = [8, 32], strides = [1, 1]} : vector<8x128xf32> to vector<8x32xf32>
    %277 = vector.extract_strided_slice %275 {offsets = [0, 32], sizes = [8, 32], strides = [1, 1]} : vector<8x128xf32> to vector<8x32xf32>
    %278 = vector.extract_strided_slice %268 {offsets = [0, 64], sizes = [8, 32], strides = [1, 1]} : vector<8x128xf32> to vector<8x32xf32>
    %279 = vector.extract_strided_slice %269 {offsets = [0, 64], sizes = [8, 32], strides = [1, 1]} : vector<8x128xf32> to vector<8x32xf32>
    %280 = arith.addf %279, %215 : vector<8x32xf32>
    %281 = arith.mulf %276, %280 : vector<8x32xf32>
    %282 = arith.addf %278, %281 : vector<8x32xf32>
    %283 = math.tanh %282 : vector<8x32xf32>
    %284 = arith.subf %262, %283 : vector<8x32xf32>
    %285 = arith.mulf %277, %284 : vector<8x32xf32>
    %286 = arith.addf %283, %285 : vector<8x32xf32>
    %287 = arith.index_cast %266 : i32 to index
    %c0_84 = arith.constant 0 : index
    %288 = vector.load %arg14[%287, %c0_84] : memref<64x32xf32, #tpu.memory_space<vmem>>, vector<8x32xf32>
    tpu.vector_store %arg14[%287, %c0_84], %286 {strides = array<i32>} : memref<64x32xf32, #tpu.memory_space<vmem>>, vector<8x32xf32>,
    %c3_i32_85 = arith.constant 3 : i32
    %c8_i32_86 = arith.constant 8 : i32
    %289 = arith.muli %c3_i32_85, %c8_i32_86 : i32
    %290 = tpu.assume_multiple %289, 8 : i32
    %291 = arith.index_cast %290 : i32 to index
    %c0_87 = arith.constant 0 : index
    %292 = vector.load %arg13[%291, %c0_87] : memref<64x128xf32, #tpu.memory_space<vmem>>, vector<8x128xf32>
    %cst_88 = arith.constant dense<0.000000e+00> : vector<8x128xf32>
    %293 = tpu.matmul %286, %206, %cst_88 {dimension_numbers = #tpu.dot_dimension_numbers<[1], [0], [0], [1], [0, 0, 1, 1], [], []>} : vector<8x32xf32>, vector<32x128xf32>, vector<8x128xf32> -> vector<8x128xf32>
    %294 = arith.addf %292, %293 : vector<8x128xf32>
    %295 = arith.negf %294 : vector<8x128xf32>
    %296 = math.exp %295 : vector<8x128xf32>
    %cst_89 = arith.constant 1.000000e+00 : f32
    %297 = vector.broadcast %cst_89 : f32 to vector<8x128xf32>
    %298 = arith.addf %297, %296 : vector<8x128xf32>
    %299 = arith.divf %297, %298 : vector<8x128xf32>
    %300 = vector.extract_strided_slice %299 {offsets = [0, 0], sizes = [8, 32], strides = [1, 1]} : vector<8x128xf32> to vector<8x32xf32>
    %301 = vector.extract_strided_slice %299 {offsets = [0, 32], sizes = [8, 32], strides = [1, 1]} : vector<8x128xf32> to vector<8x32xf32>
    %302 = vector.extract_strided_slice %292 {offsets = [0, 64], sizes = [8, 32], strides = [1, 1]} : vector<8x128xf32> to vector<8x32xf32>
    %303 = vector.extract_strided_slice %293 {offsets = [0, 64], sizes = [8, 32], strides = [1, 1]} : vector<8x128xf32> to vector<8x32xf32>
    %304 = arith.addf %303, %215 : vector<8x32xf32>
    %305 = arith.mulf %300, %304 : vector<8x32xf32>
    %306 = arith.addf %302, %305 : vector<8x32xf32>
    %307 = math.tanh %306 : vector<8x32xf32>
    %308 = arith.subf %286, %307 : vector<8x32xf32>
    %309 = arith.mulf %301, %308 : vector<8x32xf32>
    %310 = arith.addf %307, %309 : vector<8x32xf32>
    %311 = arith.index_cast %290 : i32 to index
    %c0_90 = arith.constant 0 : index
    %312 = vector.load %arg14[%311, %c0_90] : memref<64x32xf32, #tpu.memory_space<vmem>>, vector<8x32xf32>
    tpu.vector_store %arg14[%311, %c0_90], %310 {strides = array<i32>} : memref<64x32xf32, #tpu.memory_space<vmem>>, vector<8x32xf32>,
    %c4_i32_91 = arith.constant 4 : i32
    %c8_i32_92 = arith.constant 8 : i32
    %313 = arith.muli %c4_i32_91, %c8_i32_92 : i32
    %314 = tpu.assume_multiple %313, 8 : i32
    %315 = arith.index_cast %314 : i32 to index
    %c0_93 = arith.constant 0 : index
    %316 = vector.load %arg13[%315, %c0_93] : memref<64x128xf32, #tpu.memory_space<vmem>>, vector<8x128xf32>
    %cst_94 = arith.constant dense<0.000000e+00> : vector<8x128xf32>
    %317 = tpu.matmul %310, %206, %cst_94 {dimension_numbers = #tpu.dot_dimension_numbers<[1], [0], [0], [1], [0, 0, 1, 1], [], []>} : vector<8x32xf32>, vector<32x128xf32>, vector<8x128xf32> -> vector<8x128xf32>
    %318 = arith.addf %316, %317 : vector<8x128xf32>
    %319 = arith.negf %318 : vector<8x128xf32>
    %320 = math.exp %319 : vector<8x128xf32>
    %cst_95 = arith.constant 1.000000e+00 : f32
    %321 = vector.broadcast %cst_95 : f32 to vector<8x128xf32>
    %322 = arith.addf %321, %320 : vector<8x128xf32>
    %323 = arith.divf %321, %322 : vector<8x128xf32>
    %324 = vector.extract_strided_slice %323 {offsets = [0, 0], sizes = [8, 32], strides = [1, 1]} : vector<8x128xf32> to vector<8x32xf32>
    %325 = vector.extract_strided_slice %323 {offsets = [0, 32], sizes = [8, 32], strides = [1, 1]} : vector<8x128xf32> to vector<8x32xf32>
    %326 = vector.extract_strided_slice %316 {offsets = [0, 64], sizes = [8, 32], strides = [1, 1]} : vector<8x128xf32> to vector<8x32xf32>
    %327 = vector.extract_strided_slice %317 {offsets = [0, 64], sizes = [8, 32], strides = [1, 1]} : vector<8x128xf32> to vector<8x32xf32>
    %328 = arith.addf %327, %215 : vector<8x32xf32>
    %329 = arith.mulf %324, %328 : vector<8x32xf32>
    %330 = arith.addf %326, %329 : vector<8x32xf32>
    %331 = math.tanh %330 : vector<8x32xf32>
    %332 = arith.subf %310, %331 : vector<8x32xf32>
    %333 = arith.mulf %325, %332 : vector<8x32xf32>
    %334 = arith.addf %331, %333 : vector<8x32xf32>
    %335 = arith.index_cast %314 : i32 to index
    %c0_96 = arith.constant 0 : index
    %336 = vector.load %arg14[%335, %c0_96] : memref<64x32xf32, #tpu.memory_space<vmem>>, vector<8x32xf32>
    tpu.vector_store %arg14[%335, %c0_96], %334 {strides = array<i32>} : memref<64x32xf32, #tpu.memory_space<vmem>>, vector<8x32xf32>,
    %c5_i32_97 = arith.constant 5 : i32
    %c8_i32_98 = arith.constant 8 : i32
    %337 = arith.muli %c5_i32_97, %c8_i32_98 : i32
    %338 = tpu.assume_multiple %337, 8 : i32
    %339 = arith.index_cast %338 : i32 to index
    %c0_99 = arith.constant 0 : index
    %340 = vector.load %arg13[%339, %c0_99] : memref<64x128xf32, #tpu.memory_space<vmem>>, vector<8x128xf32>
    %cst_100 = arith.constant dense<0.000000e+00> : vector<8x128xf32>
    %341 = tpu.matmul %334, %206, %cst_100 {dimension_numbers = #tpu.dot_dimension_numbers<[1], [0], [0], [1], [0, 0, 1, 1], [], []>} : vector<8x32xf32>, vector<32x128xf32>, vector<8x128xf32> -> vector<8x128xf32>
    %342 = arith.addf %340, %341 : vector<8x128xf32>
    %343 = arith.negf %342 : vector<8x128xf32>
    %344 = math.exp %343 : vector<8x128xf32>
    %cst_101 = arith.constant 1.000000e+00 : f32
    %345 = vector.broadcast %cst_101 : f32 to vector<8x128xf32>
    %346 = arith.addf %345, %344 : vector<8x128xf32>
    %347 = arith.divf %345, %346 : vector<8x128xf32>
    %348 = vector.extract_strided_slice %347 {offsets = [0, 0], sizes = [8, 32], strides = [1, 1]} : vector<8x128xf32> to vector<8x32xf32>
    %349 = vector.extract_strided_slice %347 {offsets = [0, 32], sizes = [8, 32], strides = [1, 1]} : vector<8x128xf32> to vector<8x32xf32>
    %350 = vector.extract_strided_slice %340 {offsets = [0, 64], sizes = [8, 32], strides = [1, 1]} : vector<8x128xf32> to vector<8x32xf32>
    %351 = vector.extract_strided_slice %341 {offsets = [0, 64], sizes = [8, 32], strides = [1, 1]} : vector<8x128xf32> to vector<8x32xf32>
    %352 = arith.addf %351, %215 : vector<8x32xf32>
    %353 = arith.mulf %348, %352 : vector<8x32xf32>
    %354 = arith.addf %350, %353 : vector<8x32xf32>
    %355 = math.tanh %354 : vector<8x32xf32>
    %356 = arith.subf %334, %355 : vector<8x32xf32>
    %357 = arith.mulf %349, %356 : vector<8x32xf32>
    %358 = arith.addf %355, %357 : vector<8x32xf32>
    %359 = arith.index_cast %338 : i32 to index
    %c0_102 = arith.constant 0 : index
    %360 = vector.load %arg14[%359, %c0_102] : memref<64x32xf32, #tpu.memory_space<vmem>>, vector<8x32xf32>
    tpu.vector_store %arg14[%359, %c0_102], %358 {strides = array<i32>} : memref<64x32xf32, #tpu.memory_space<vmem>>, vector<8x32xf32>,
    %c6_i32_103 = arith.constant 6 : i32
    %c8_i32_104 = arith.constant 8 : i32
    %361 = arith.muli %c6_i32_103, %c8_i32_104 : i32
    %362 = tpu.assume_multiple %361, 8 : i32
    %363 = arith.index_cast %362 : i32 to index
    %c0_105 = arith.constant 0 : index
    %364 = vector.load %arg13[%363, %c0_105] : memref<64x128xf32, #tpu.memory_space<vmem>>, vector<8x128xf32>
    %cst_106 = arith.constant dense<0.000000e+00> : vector<8x128xf32>
    %365 = tpu.matmul %358, %206, %cst_106 {dimension_numbers = #tpu.dot_dimension_numbers<[1], [0], [0], [1], [0, 0, 1, 1], [], []>} : vector<8x32xf32>, vector<32x128xf32>, vector<8x128xf32> -> vector<8x128xf32>
    %366 = arith.addf %364, %365 : vector<8x128xf32>
    %367 = arith.negf %366 : vector<8x128xf32>
    %368 = math.exp %367 : vector<8x128xf32>
    %cst_107 = arith.constant 1.000000e+00 : f32
    %369 = vector.broadcast %cst_107 : f32 to vector<8x128xf32>
    %370 = arith.addf %369, %368 : vector<8x128xf32>
    %371 = arith.divf %369, %370 : vector<8x128xf32>
    %372 = vector.extract_strided_slice %371 {offsets = [0, 0], sizes = [8, 32], strides = [1, 1]} : vector<8x128xf32> to vector<8x32xf32>
    %373 = vector.extract_strided_slice %371 {offsets = [0, 32], sizes = [8, 32], strides = [1, 1]} : vector<8x128xf32> to vector<8x32xf32>
    %374 = vector.extract_strided_slice %364 {offsets = [0, 64], sizes = [8, 32], strides = [1, 1]} : vector<8x128xf32> to vector<8x32xf32>
    %375 = vector.extract_strided_slice %365 {offsets = [0, 64], sizes = [8, 32], strides = [1, 1]} : vector<8x128xf32> to vector<8x32xf32>
    %376 = arith.addf %375, %215 : vector<8x32xf32>
    %377 = arith.mulf %372, %376 : vector<8x32xf32>
    %378 = arith.addf %374, %377 : vector<8x32xf32>
    %379 = math.tanh %378 : vector<8x32xf32>
    %380 = arith.subf %358, %379 : vector<8x32xf32>
    %381 = arith.mulf %373, %380 : vector<8x32xf32>
    %382 = arith.addf %379, %381 : vector<8x32xf32>
    %383 = arith.index_cast %362 : i32 to index
    %c0_108 = arith.constant 0 : index
    %384 = vector.load %arg14[%383, %c0_108] : memref<64x32xf32, #tpu.memory_space<vmem>>, vector<8x32xf32>
    tpu.vector_store %arg14[%383, %c0_108], %382 {strides = array<i32>} : memref<64x32xf32, #tpu.memory_space<vmem>>, vector<8x32xf32>,
    %c7_i32_109 = arith.constant 7 : i32
    %c8_i32_110 = arith.constant 8 : i32
    %385 = arith.muli %c7_i32_109, %c8_i32_110 : i32
    %386 = tpu.assume_multiple %385, 8 : i32
    %387 = arith.index_cast %386 : i32 to index
    %c0_111 = arith.constant 0 : index
    %388 = vector.load %arg13[%387, %c0_111] : memref<64x128xf32, #tpu.memory_space<vmem>>, vector<8x128xf32>
    %cst_112 = arith.constant dense<0.000000e+00> : vector<8x128xf32>
    %389 = tpu.matmul %382, %206, %cst_112 {dimension_numbers = #tpu.dot_dimension_numbers<[1], [0], [0], [1], [0, 0, 1, 1], [], []>} : vector<8x32xf32>, vector<32x128xf32>, vector<8x128xf32> -> vector<8x128xf32>
    %390 = arith.addf %388, %389 : vector<8x128xf32>
    %391 = arith.negf %390 : vector<8x128xf32>
    %392 = math.exp %391 : vector<8x128xf32>
    %cst_113 = arith.constant 1.000000e+00 : f32
    %393 = vector.broadcast %cst_113 : f32 to vector<8x128xf32>
    %394 = arith.addf %393, %392 : vector<8x128xf32>
    %395 = arith.divf %393, %394 : vector<8x128xf32>
    %396 = vector.extract_strided_slice %395 {offsets = [0, 0], sizes = [8, 32], strides = [1, 1]} : vector<8x128xf32> to vector<8x32xf32>
    %397 = vector.extract_strided_slice %395 {offsets = [0, 32], sizes = [8, 32], strides = [1, 1]} : vector<8x128xf32> to vector<8x32xf32>
    %398 = vector.extract_strided_slice %388 {offsets = [0, 64], sizes = [8, 32], strides = [1, 1]} : vector<8x128xf32> to vector<8x32xf32>
    %399 = vector.extract_strided_slice %389 {offsets = [0, 64], sizes = [8, 32], strides = [1, 1]} : vector<8x128xf32> to vector<8x32xf32>
    %400 = arith.addf %399, %215 : vector<8x32xf32>
    %401 = arith.mulf %396, %400 : vector<8x32xf32>
    %402 = arith.addf %398, %401 : vector<8x32xf32>
    %403 = math.tanh %402 : vector<8x32xf32>
    %404 = arith.subf %382, %403 : vector<8x32xf32>
    %405 = arith.mulf %397, %404 : vector<8x32xf32>
    %406 = arith.addf %403, %405 : vector<8x32xf32>
    %407 = arith.index_cast %386 : i32 to index
    %c0_114 = arith.constant 0 : index
    %408 = vector.load %arg14[%407, %c0_114] : memref<64x32xf32, #tpu.memory_space<vmem>>, vector<8x32xf32>
    tpu.vector_store %arg14[%407, %c0_114], %406 {strides = array<i32>} : memref<64x32xf32, #tpu.memory_space<vmem>>, vector<8x32xf32>,
    %c8_i32_115 = arith.constant 8 : i32
    %c0_116 = arith.constant 0 : index
    %c0_117 = arith.constant 0 : index
    %409 = vector.load %arg10[%c0_116, %c0_117] : memref<32x32xf32, #tpu.memory_space<vmem>>, vector<32x32xf32>
    %c0_118 = arith.constant 0 : index
    %c0_119 = arith.constant 0 : index
    %410 = vector.load %arg11[%c0_118, %c0_119] : memref<1x32xf32, #tpu.memory_space<vmem>>, vector<1x32xf32>
    %c0_120 = arith.constant 0 : index
    %c0_121 = arith.constant 0 : index
    %411 = vector.load %arg14[%c0_120, %c0_121] : memref<64x32xf32, #tpu.memory_space<vmem>>, vector<64x32xf32>
    %cst_122 = arith.constant dense<0.000000e+00> : vector<64x32xf32>
    %412 = tpu.matmul %411, %409, %cst_122 {dimension_numbers = #tpu.dot_dimension_numbers<[1], [0], [0], [1], [0, 0, 1, 1], [], []>} : vector<64x32xf32>, vector<32x32xf32>, vector<64x32xf32> -> vector<64x32xf32>
    %413 = vector.broadcast %410 : vector<1x32xf32> to vector<64x32xf32>
    %414 = arith.addf %412, %413 : vector<64x32xf32>
    %415 = arith.negf %414 : vector<64x32xf32>
    %416 = math.exp %415 : vector<64x32xf32>
    %cst_123 = arith.constant 1.000000e+00 : f32
    %417 = vector.broadcast %cst_123 : f32 to vector<64x32xf32>
    %418 = arith.addf %417, %416 : vector<64x32xf32>
    %419 = arith.divf %417, %418 : vector<64x32xf32>
    %420 = vector.shape_cast %419 : vector<64x32xf32> to vector<8x8x32xf32>
    %c0_124 = arith.constant 0 : index
    %c0_125 = arith.constant 0 : index
    %c0_126 = arith.constant 0 : index
    %421 = vector.load %arg12[%c0_124, %c0_125, %c0_126] : memref<8x8x32xf32, #tpu.memory_space<vmem>>, vector<8x8x32xf32>
    tpu.vector_store %arg12[%c0_124, %c0_125, %c0_126], %420 {strides = array<i32>} : memref<8x8x32xf32, #tpu.memory_space<vmem>>, vector<8x8x32xf32>,
    return
  }
  func.func @transform_0(%arg0: i32) -> (i32, i32, i32) {
    %c0_i32 = arith.constant 0 : i32
    %c0_i32_0 = arith.constant 0 : i32
    %c0_i32_1 = arith.constant 0 : i32
    return %c0_i32, %arg0, %c0_i32_0 : i32, i32, i32
  }
  func.func @transform_1(%arg0: i32) -> (i32, i32) {
    %c0_i32 = arith.constant 0 : i32
    %c0_i32_0 = arith.constant 0 : i32
    %c0_i32_1 = arith.constant 0 : i32
    return %c0_i32, %c0_i32_0 : i32, i32
  }
  func.func @transform_2(%arg0: i32) -> (i32, i32) {
    %c0_i32 = arith.constant 0 : i32
    %c0_i32_0 = arith.constant 0 : i32
    %c0_i32_1 = arith.constant 0 : i32
    return %c0_i32, %c0_i32_0 : i32, i32
  }
  func.func @transform_3(%arg0: i32) -> (i32, i32) {
    %c0_i32 = arith.constant 0 : i32
    %c0_i32_0 = arith.constant 0 : i32
    %c0_i32_1 = arith.constant 0 : i32
    return %c0_i32, %c0_i32_0 : i32, i32
  }
  func.func @transform_4(%arg0: i32) -> (i32, i32) {
    %c0_i32 = arith.constant 0 : i32
    %c0_i32_0 = arith.constant 0 : i32
    %c0_i32_1 = arith.constant 0 : i32
    return %c0_i32, %c0_i32_0 : i32, i32
  }
  func.func @transform_5(%arg0: i32) -> (i32, i32) {
    %c0_i32 = arith.constant 0 : i32
    %c0_i32_0 = arith.constant 0 : i32
    %c0_i32_1 = arith.constant 0 : i32
    return %c0_i32, %c0_i32_0 : i32, i32
  }
  func.func @transform_6(%arg0: i32) -> (i32, i32) {
    %c0_i32 = arith.constant 0 : i32
    %c0_i32_0 = arith.constant 0 : i32
    %c0_i32_1 = arith.constant 0 : i32
    return %c0_i32, %c0_i32_0 : i32, i32
  }
  func.func @transform_7(%arg0: i32) -> (i32, i32) {
    %c0_i32 = arith.constant 0 : i32
    %c0_i32_0 = arith.constant 0 : i32
    %c0_i32_1 = arith.constant 0 : i32
    return %c0_i32, %c0_i32_0 : i32, i32
  }
  func.func @transform_8(%arg0: i32) -> (i32, i32) {
    %c0_i32 = arith.constant 0 : i32
    %c0_i32_0 = arith.constant 0 : i32
    %c0_i32_1 = arith.constant 0 : i32
    return %c0_i32, %c0_i32_0 : i32, i32
  }
  func.func @transform_9(%arg0: i32) -> (i32, i32) {
    %c0_i32 = arith.constant 0 : i32
    %c0_i32_0 = arith.constant 0 : i32
    %c0_i32_1 = arith.constant 0 : i32
    return %c0_i32, %c0_i32_0 : i32, i32
  }
  func.func @transform_10(%arg0: i32) -> (i32, i32) {
    %c0_i32 = arith.constant 0 : i32
    %c0_i32_0 = arith.constant 0 : i32
    %c0_i32_1 = arith.constant 0 : i32
    return %c0_i32, %c0_i32_0 : i32, i32
  }
  func.func @transform_11(%arg0: i32) -> (i32, i32, i32) {
    %c0_i32 = arith.constant 0 : i32
    %c0_i32_0 = arith.constant 0 : i32
    %c0_i32_1 = arith.constant 0 : i32
    return %c0_i32, %arg0, %c0_i32_0 : i32, i32, i32
  }
}

</mosaic_0001>

<bundles_post_ra>
// kernel: tpu_custom_call.1
= control target key start
LH: loop header
LB: loop body
LE: loop exit
PB: predicated region body
PF: predicated region fallthrough
CT: control target
= control target key end

     0   :  { %16 = vsyncpa [#allocation5], 0  ;;  %s3686_s0 = inlined_call_operand.vmem [shape: f32[8,8,4], index: 0, kind: input, shape index: {}]   ;;  %s3687_s1 = inlined_call_operand.hbm [shape: f32[4,128], index: 1, kind: input, shape index: {}]   ;;  %s3688_s2 = inlined_call_operand.vmem [shape: f32[32,128], index: 2, kind: input, shape index: {}]   ;;  %s3689_s3 = inlined_call_operand.vmem [shape: f32[1,128], index: 3, kind: input, shape index: {}]   ;;  %s3690_s4 = inlined_call_operand.vmem [shape: f32[1,32], index: 4, kind: input, shape index: {}]   ;;  %s3691_s5 = inlined_call_operand.vmem [shape: f32[32,128], index: 5, kind: input, shape index: {}]   ;;  %s3692_s6 = inlined_call_operand.vmem [shape: f32[32,128], index: 6, kind: input, shape index: {}]   ;;  %s3693_s7 = inlined_call_operand.hbm [shape: f32[1,128], index: 7, kind: input, shape index: {}]   ;;  %s3694_s8 = inlined_call_operand.hbm [shape: f32[1,32], index: 8, kind: input, shape index: {}]   ;;  %s3695_s9 = inlined_call_operand.vmem [shape: f32[32,32], index: 9, kind: input, shape index: {}]   ;;  %s3696_s10 = inlined_call_operand.vmem [shape: f32[1,32], index: 10, kind: input, shape index: {}]   ;;  %s3697_s11 = inlined_call_operand.hbm [shape: f32[8,8,32], index: 11, kind: output, shape index: {}]  }
   0x1   :  { %17 = vsyncpa [#allocation8], 0 }
   0x2   :  { %18 = vsyncpa [#allocation6], 0  ;;  %s3137_s17 = smov [#allocation7]   ;;  %s3138_s19 = smov [#allocation4]  }
   0x3   :  { %s47_s18 = sshll.u32 %s3137_s17, 4  ;;  %s27_s20 = sshll.u32 %s3138_s19, 4  ;;  %s48_s18 = int_to_ptr.vmem [resolvable:$true] %s47_s18  ;;  %s28_s20 = int_to_ptr.vmem [resolvable:$true] %s27_s20 }
   0x4   :  { %s3043_s23 = scalar_lea.hbm %s3693_s7, 16 }
   0x5   :  { %p3044_p0 = scmp.ne.s32.totalorder %s3693_s7, %s3043_s23  ;;  %p3047_p1 = scmp.lt.u32.totalorder %s3043_s23, %s3693_s7 }
   0x7   :  { %p3049_p2 = pnand %p3047_p1, %p3044_p0 }
   0x9   :  { %3052 = shalt.err (!%p3049_p2)
}
   0xa   :  { %s3053_s28 = scalar_lea.vmem %s48_s18, 16  ;;  %s3057_s29 = scalar_lea.vmem %s48_s18, 32 }
   0xb   :  { %p3054_p3 = scmp.ne.s32.totalorder %s48_s18, %s3053_s28  ;;  %p3058_p4 = scmp.lt.s32.totalorder %s48_s18, %s48_s18 }
   0xc   :  { %p3059_p5 = scmp.lt.s32.totalorder %s3057_s29, %s3053_s28 }
   0xe   :  { %p3060_p6 = por %p3059_p5, %p3058_p4 }
  0x10   :  { %p3061_p7 = pnand %p3060_p6, %p3054_p3 }
  0x12   :  { %3064 = shalt.err (!%p3061_p7)
}
  0x13   :  { %50 = dma.hbm_to_vmem [thread:$0]  %s3693_s7, 16, %s48_s18, [#allocation8]  }
  0x14   :  { %s3065_s15 = scalar_lea.hbm %s3687_s1, 64 }
  0x15   :  { %p3066_p8 = scmp.ne.s32.totalorder %s3687_s1, %s3065_s15  ;;  %p3069_p9 = scmp.lt.u32.totalorder %s3065_s15, %s3687_s1 }
  0x17   :  { %p3071_p10 = pnand %p3069_p9, %p3066_p8 }
  0x19   :  { %3074 = shalt.err (!%p3071_p10)
}
  0x1a   :  { %s3075_s22 = scalar_lea.vmem %s28_s20, 64  ;;  %p3080_p12 = scmp.lt.s32.totalorder %s28_s20, %s28_s20 }
  0x1b   :  { %p3076_p11 = scmp.ne.s32.totalorder %s28_s20, %s3075_s22  ;;  %p3081_p13 = scmp.lt.s32.totalorder %s3075_s22, %s3075_s22 }
  0x1d   :  { %p3082_p0 = por %p3081_p13, %p3080_p12 }
  0x1f   :  { %p3083_p1 = pnand %p3082_p0, %p3076_p11 }
  0x21   :  { %3086 = shalt.err (!%p3083_p1)
}
  0x22   :  { %30 = dma.hbm_to_vmem [thread:$0]  %s3687_s1, 64, %s28_s20, [#allocation5]  }
  0x23   :  { %s3139_s23 = smov [#allocation9]   ;;  %s3087_s27 = scalar_lea.hbm %s3694_s8, 16 }
  0x24   :  { %s57_s24 = sshll.u32 %s3139_s23, 4  ;;  %p3088_p2 = scmp.ne.s32.totalorder %s3694_s8, %s3087_s27  ;;  %s58_s24 = int_to_ptr.vmem [resolvable:$true] %s57_s24 }
  0x25   :  { %p3091_p3 = scmp.lt.u32.totalorder %s3087_s27, %s3694_s8 }
  0x27   :  { %p3093_p4 = pnand %p3091_p3, %p3088_p2 }
  0x29   :  { %3096 = shalt.err (!%p3093_p4)
}
  0x2a   :  { %s3097_s13 = scalar_lea.vmem %s58_s24, 16  ;;  %s3101_s1 = scalar_lea.vmem %s58_s24, 32 }
  0x2b   :  { %p3098_p5 = scmp.ne.s32.totalorder %s58_s24, %s3097_s13  ;;  %p3102_p6 = scmp.lt.s32.totalorder %s58_s24, %s58_s24 }
  0x2c   :  { %p3103_p7 = scmp.lt.s32.totalorder %s3101_s1, %s3097_s13 }
  0x2e   :  { %p3104_p8 = por %p3103_p7, %p3102_p6 }
  0x30   :  { %p3105_p9 = pnand %p3104_p8, %p3098_p5 }
  0x32   :  { %3108 = shalt.err (!%p3105_p9)
}
  0x33   :  { %60 = dma.hbm_to_vmem [thread:$0]  %s3694_s8, 16, %s58_s24, [#allocation8]  }
  0x34   :  { %3131 = dma.done.wait [#allocation5], 64  }
  0x35   :  { %3132 = vsyncadd [#allocation5], 4294967232 }
  0x36   :  { %3133 = dma.done.wait [#allocation8], 32  }
  0x37   :  { %3134 = vsyncadd [#allocation8], 4294967264  ;;  %vm120_vm0 = vcmask 1043456   ;;  %vm95_vm1 = vcmask 31744   ;;  %v74_v0 = vld [vmem:[#allocation4] sm:$0xf] }
  0x38   :  { %v85_v1 = vld [vmem:[%s3686_s0 + $0x20] sm:$0xff]  ;;  %v86_v2 = vld [vmem:[%s3686_s0 + $0x28] sm:$0xff]  ;;  %2901 = vmatprep.subr.msk.mxu1 %vm120_vm0, %v74_v0  ;;  %v87_v5 = vld [vmem:[%s3686_s0 + $0x30] sm:$0xff]  ;;  %2559 = vmatprep.subr.msk.mxu0 %vm120_vm0, %v74_v0  ;;  %v3140_v8 = vmov 0.0|0.0   ;;  %vm3142_vm2 = vmmov 0   ;;  %v3143_v15 = vmov 0.0  }
  0x39   :  { %2567 = vmatprep.mubr.msk.f32.mxu1 %vm95_vm1, %v85_v1  ;;  %v75_v3 = vld [vmem:[%s3688_s2] sm:$0xff]  ;;  %v76_v4 = vld [vmem:[%s3688_s2 + $0x8] sm:$0xff]  ;;  %2902 = vmatpush3.msk.msra.mxu1 %vm120_vm0, %v74_v0  ;;  %v77_v7 = vld [vmem:[%s3688_s2 + $0x10] sm:$0xff]  ;;  %s3145_s16 = smov 32   ;;  %vm243_vm3 = vcmask 261120  }
  0x3a   :  { %v3263_v6 = vpack.c.bf16 %v76_v4, %v75_v3  ;;  %2568 = vmatmul.mubr.msk.f32.vlgmr.msra.gmra.mrb[0].mxu1 %vm95_vm1, %v86_v2  ;;  %2789 = vmatprep.subr.bf16.mxu1 %v3140_v8  ;;  %v81_v9 = vld [vmem:[%s3686_s0] sm:$0xff]  ;;  %v78_v10 = vld [vmem:[%s3688_s2 + $0x18] sm:$0xff]  ;;  %v82_v14 = vld [vmem:[%s3686_s0 + $0x8] sm:$0xff]  ;;  %s3141_s2 = smov 64  }
  0x3b   :  { %v2388_v11 = vld [vmem:[%s3690_s4] ss:$0 sm:$0xff]  ;;  %2570 = vmatprep.mubr.msk.f32.mxu1 %vm95_vm1, %v87_v5  ;;  %v88_v12 = vld [vmem:[%s3686_s0 + $0x38] sm:$0xff]  ;;  %v3285_v13 = vpack.c.bf16 %v78_v10, %v77_v7  ;;  %2560 = vmatpush3.msk.msra.mxu0 %vm120_vm0, %v74_v0  ;;  %v83_v59 = vld [vmem:[%s3686_s0 + $0x10] sm:$0xff] }
  0x3c   :  { %2791 = vmatpush3.bf16.msra.mxu1 %v3263_v6  ;;  %2561 = vmatprep.mubr.msk.f32.mxu0 %vm95_vm1, %v81_v9  ;;  %v3327_v26 = vld [vmem:[%s3689_s3] ss:$0 sm:$0xff]  ;;  %s3144_s3 = smov 96   ;;  %v84_v60 = vld [vmem:[%s3686_s0 + $0x18] sm:$0xff] }
  0x3d   :  { %2792 = vmatprep.subr.bf16.mxu1 %v3140_v8  ;;  %324 = vrot.lane.b32.xlu0 %v2388_v11, %s3141_s2 }
  0x3e   :  { %2571 = vmatmul.mubr.msk.f32.gmra.mrb[2].mxu1 %vm95_vm1, %v88_v12  ;;  %2562 = vmatmul.mubr.msk.f32.vlgmr.msra.gmra.mrb[0].mxu0 %vm95_vm1, %v82_v14 }
  0x3f   :  { %2581 = vmatprep.mubr.msk.f32.mxu1 %vm3142_vm2, %v3143_v15  ;;  %2801 = vmatprep.subr.bf16.mxu0 %v3140_v8 }
  0x40   :  { %2794 = vmatpush3.bf16.msra.mxu1 %v3285_v13  ;;  %2803 = vmatpush3.bf16.msra.mxu0 %v3263_v6 }
  0x41   :  { %2795 = vmatprep.subr.bf16.mxu1 %v3140_v8  ;;  %2804 = vmatprep.subr.bf16.mxu0 %v3140_v8 }
  0x42   :  { %2564 = vmatprep.mubr.msk.f32.mxu0 %vm95_vm1, %v83_v59 }
  0x43   :  { %2582 = vmatmul.mubr.f32.vlgmr.msra.gmra.mrb[4].mxu1 %v3143_v15  ;;  %2565 = vmatmul.mubr.msk.f32.gmra.mrb[2].mxu0 %vm95_vm1, %v84_v60 }
  0x44   :  { %2797 = vmatpush3.bf16.msra.mxu1 %v3263_v6  ;;  %2592 = vmatprep.mubr.msk.f32.mxu1 %vm3142_vm2, %v3143_v15 }
  0x45   :  { %2798 = vmatprep.subr.bf16.mxu1 %v3140_v8  ;;  %2806 = vmatpush3.bf16.msra.mxu0 %v3285_v13 }
  0x46   :  { %2813 = vmatprep.subr.bf16.mxu0 %v3140_v8  ;;  %2603 = vmatprep.mubr.msk.f32.mxu0 %vm3142_vm2, %v3143_v15 }
  0x48   :  { %2800 = vmatpush3.bf16.msra.mxu1 %v3285_v13 }
  0x49   :  { %2807 = vmatprep.subr.bf16.mxu1 %v3140_v8 }
  0xaf   :  { %v3320_v22 = vpop.permute.xlu0 %324 }
 0x10d   :  { %v3312_v16 = vpop.f32.mrb[0].mxu1 }
 0x10e   :  { %v3314_v17 = vpop.f32.mrb[1].mxu1 }
 0x111   :  { %v3316_v18 = vpop.f32.mrb[2].mxu1  ;;  %v2563_v19 = vpop.f32.mrb[0].mxu0 }
 0x112   :  { %v3318_v20 = vpop.f32.mrb[3].mxu1  ;;  %v190_v21 = vpop.f32.mrb[1].mxu0  ;;  %v196_v47 = vadd.f32 %v2563_v19, %v3327_v26 }
 0x113   :  { %v191_v27 = vadd.f32 %v3327_v26, %v190_v21 }
 0x116   :  { %v313_v23 = vpop.f32.mrb[4].mxu1  ;;  %v2566_v1 = vpop.f32.mrb[2].mxu0 }
 0x117   :  { %v327_v24 = vadd.f32 %v3320_v22, %v313_v23  ;;  %v2583_v25 = vpop.f32.mrb[5].mxu1  ;;  %v317_v28 = vadd.f32 %v313_v23, %v191_v27  ;;  %v200_v2 = vpop.f32.mrb[3].mxu0 }
 0x118   :  { %v201_v9 = vadd.f32 %v3327_v26, %v200_v2 }
 0x119   :  { %329 = vrot.lane.b32.xlu0 %v327_v24, %s3141_s2  ;;  %v2389_v29 = vmul.f32 -1.442695, %v317_v28 }
 0x11b   :  { %2915 = vpow2.f32 %v2389_v29 }
 0x125   :  { %v2916_v30 = vpop.eup %2915 }
 0x126   :  { %v321_v31 = vadd.f32 1.0, %v2916_v30 }
 0x128   :  { %2917 = vrcp.f32 %v321_v31 }
 0x132   :  { %v2918_v32 = vpop.eup %2917 }
 0x18b   :  { %v330_v33 = vpop.permute.xlu0 %329 }
 0x18c   :  { %v332_v34 = vmul.f32 %v2918_v32, %v330_v33 }
 0x18e   :  { %334 = vrot.lane.b32.xlu1 %v332_v34, %s3141_s2 }
 0x200   :  { %v335_v35 = vpop.permute.xlu1 %334 }
 0x201   :  { %v337_v36 = vadd.f32 %v335_v35, %v191_v27 }
 0x203   :  { %2919 = vtanh.f32 %v337_v36 }
 0x20d   :  { %v2920_v37 = vpop.eup %2919 }
 0x20e   :  { %v339_v38 = vsub.f32 0.0, %v2920_v37 }
 0x210   :  { %341 = vrot.lane.b32.xlu1 %v339_v38, %s3144_s3 }
 0x282   :  { %v342_v39 = vpop.permute.xlu1 %341 }
 0x283   :  { %v344_v40 = vmul.f32 %v2918_v32, %v342_v39 }
 0x285   :  { %346 = vrot.lane.b32.xlu0 %v344_v40, %s3145_s16 }
 0x2f7   :  { %v347_v41 = vpop.permute.xlu0 %346 }
 0x2f8   :  { %v349_v42 = vadd.f32 %v2920_v37, %v347_v41  ;;  %v206_v37 = vadd.f32 %v2566_v1, %v3327_v26 }
 0x2fa   :  { %351 = vrot.lane.b32.xlu1 %v349_v42, %s3141_s2 }
 0x36c   :  { %v352_v43 = vpop.permute.xlu1 %351 }
 0x36d   :  { %354 = vst.msk [vmem:[#allocation3] sm:$0xff] %vm243_vm3, %v352_v43  ;;  %2593 = vmatmul.mubr.msk.f32.vlgmr.msra.gmra.mrb[6].mxu1 %vm243_vm3, %v352_v43 }
 0x36e   :  { %2809 = vmatpush3.bf16.msra.mxu1 %v3263_v6  ;;  %2614 = vmatprep.mubr.msk.f32.mxu1 %vm3142_vm2, %v3143_v15 }
 0x36f   :  { %2810 = vmatprep.subr.bf16.mxu1 %v3140_v8 }
 0x372   :  { %2812 = vmatpush3.bf16.msra.mxu1 %v3285_v13 }
 0x373   :  { %2819 = vmatprep.subr.bf16.mxu1 %v3140_v8 }
 0x440   :  { %v425_v44 = vpop.f32.mrb[6].mxu1 }
 0x441   :  { %v436_v45 = vadd.f32 %v425_v44, %v3320_v22  ;;  %v2594_v46 = vpop.f32.mrb[7].mxu1  ;;  %v429_v48 = vadd.f32 %v425_v44, %v196_v47 }
 0x443   :  { %438 = vrot.lane.b32.xlu0 %v436_v45, %s3141_s2  ;;  %v2391_v49 = vmul.f32 -1.442695, %v429_v48 }
 0x445   :  { %2921 = vpow2.f32 %v2391_v49 }
 0x44f   :  { %v2922_v50 = vpop.eup %2921 }
 0x450   :  { %v433_v51 = vadd.f32 1.0, %v2922_v50 }
 0x452   :  { %2923 = vrcp.f32 %v433_v51 }
 0x45c   :  { %v2924_v52 = vpop.eup %2923 }
 0x4b5   :  { %v439_v53 = vpop.permute.xlu0 %438 }
 0x4b6   :  { %v441_v54 = vmul.f32 %v2924_v52, %v439_v53 }
 0x4b8   :  { %443 = vrot.lane.b32.xlu1 %v441_v54, %s3141_s2 }
 0x52a   :  { %v444_v55 = vpop.permute.xlu1 %443 }
 0x52b   :  { %v446_v56 = vadd.f32 %v444_v55, %v196_v47 }
 0x52d   :  { %2925 = vtanh.f32 %v446_v56 }
 0x537   :  { %v2926_v57 = vpop.eup %2925 }
 0x538   :  { %v448_v58 = vsub.f32 %v349_v42, %v2926_v57 }
 0x53a   :  { %450 = vrot.lane.b32.xlu0 %v448_v58, %s3144_s3 }
 0x5ac   :  { %v451_v61 = vpop.permute.xlu0 %450 }
 0x5ad   :  { %v453_v62 = vmul.f32 %v2924_v52, %v451_v61 }
 0x5af   :  { %455 = vrot.lane.b32.xlu1 %v453_v62, %s3145_s16 }
 0x621   :  { %v456_v63 = vpop.permute.xlu1 %455 }
 0x622   :  { %v458_v0 = vadd.f32 %v2926_v57, %v456_v63  ;;  %v211_v57 = vadd.f32 %v3327_v26, %v3314_v17 }
 0x624   :  { %460 = vrot.lane.b32.xlu0 %v458_v0, %s3141_s2 }
 0x696   :  { %v461_v3 = vpop.permute.xlu0 %460 }
 0x697   :  { %464 = vst.msk [vmem:[#allocation3 + $0x8] sm:$0xff] %vm243_vm3, %v461_v3  ;;  %2604 = vmatmul.mubr.msk.f32.vlgmr.msra.gmra.mrb[4].mxu0 %vm243_vm3, %v461_v3 }
 0x698   :  { %2815 = vmatpush3.bf16.msra.mxu0 %v3263_v6  ;;  %2625 = vmatprep.mubr.msk.f32.mxu0 %vm3142_vm2, %v3143_v15 }
 0x699   :  { %2816 = vmatprep.subr.bf16.mxu0 %v3140_v8 }
 0x69c   :  { %2818 = vmatpush3.bf16.msra.mxu0 %v3285_v13 }
 0x69d   :  { %2825 = vmatprep.subr.bf16.mxu0 %v3140_v8 }
 0x76a   :  { %v535_v4 = vpop.f32.mrb[4].mxu0 }
 0x76b   :  { %v546_v5 = vadd.f32 %v535_v4, %v3320_v22  ;;  %v2605_v7 = vpop.f32.mrb[5].mxu0  ;;  %v539_v10 = vadd.f32 %v535_v4, %v201_v9 }
 0x76d   :  { %548 = vrot.lane.b32.xlu1 %v546_v5, %s3141_s2  ;;  %v2393_v11 = vmul.f32 -1.442695, %v539_v10 }
 0x76f   :  { %2927 = vpow2.f32 %v2393_v11 }
 0x779   :  { %v2928_v12 = vpop.eup %2927 }
 0x77a   :  { %v543_v14 = vadd.f32 1.0, %v2928_v12 }
 0x77c   :  { %2929 = vrcp.f32 %v543_v14 }
 0x786   :  { %v2930_v19 = vpop.eup %2929 }
 0x7df   :  { %v549_v21 = vpop.permute.xlu1 %548 }
 0x7e0   :  { %v551_v23 = vmul.f32 %v2930_v19, %v549_v21 }
 0x7e2   :  { %553 = vrot.lane.b32.xlu0 %v551_v23, %s3141_s2 }
 0x854   :  { %v554_v24 = vpop.permute.xlu0 %553 }
 0x855   :  { %v556_v25 = vadd.f32 %v554_v24, %v201_v9 }
 0x857   :  { %2931 = vtanh.f32 %v556_v25 }
 0x861   :  { %v2932_v27 = vpop.eup %2931 }
 0x862   :  { %v558_v28 = vsub.f32 %v458_v0, %v2932_v27 }
 0x864   :  { %560 = vrot.lane.b32.xlu1 %v558_v28, %s3144_s3 }
 0x8d6   :  { %v561_v29 = vpop.permute.xlu1 %560 }
 0x8d7   :  { %v563_v30 = vmul.f32 %v2930_v19, %v561_v29  ;;  %v216_v19 = vadd.f32 %v3312_v16, %v3327_v26  ;;  %v1125_v16 = vld [vmem:[%s3691_s5] sm:$0xff] }
 0x8d9   :  { %565 = vrot.lane.b32.xlu0 %v563_v30, %s3145_s16 }
 0x94b   :  { %v566_v31 = vpop.permute.xlu0 %565 }
 0x94c   :  { %v568_v32 = vadd.f32 %v2932_v27, %v566_v31 }
 0x94e   :  { %570 = vrot.lane.b32.xlu1 %v568_v32, %s3141_s2 }
 0x9c0   :  { %v571_v33 = vpop.permute.xlu1 %570 }
 0x9c1   :  { %574 = vst.msk [vmem:[#allocation3 + $0x10] sm:$0xff] %vm243_vm3, %v571_v33  ;;  %2615 = vmatmul.mubr.msk.f32.vlgmr.msra.gmra.mrb[8].mxu1 %vm243_vm3, %v571_v33 }
 0x9c2   :  { %2821 = vmatpush3.bf16.msra.mxu1 %v3263_v6  ;;  %2636 = vmatprep.mubr.msk.f32.mxu1 %vm3142_vm2, %v3143_v15 }
 0x9c3   :  { %2822 = vmatprep.subr.bf16.mxu1 %v3140_v8 }
 0x9c6   :  { %2824 = vmatpush3.bf16.msra.mxu1 %v3285_v13 }
 0x9c7   :  { %2831 = vmatprep.subr.bf16.mxu1 %v3140_v8 }
 0xa94   :  { %v645_v34 = vpop.f32.mrb[8].mxu1 }
 0xa95   :  { %v656_v35 = vadd.f32 %v645_v34, %v3320_v22  ;;  %v2616_v36 = vpop.f32.mrb[9].mxu1  ;;  %v649_v38 = vadd.f32 %v645_v34, %v206_v37 }
 0xa97   :  { %658 = vrot.lane.b32.xlu0 %v656_v35, %s3141_s2  ;;  %v2395_v39 = vmul.f32 -1.442695, %v649_v38  ;;  %v1127_v38 = vld [vmem:[%s3691_s5 + $0x10] sm:$0xff] }
 0xa99   :  { %2933 = vpow2.f32 %v2395_v39  ;;  %v1128_v39 = vld [vmem:[%s3691_s5 + $0x18] sm:$0xff] }
 0xaa3   :  { %v2934_v40 = vpop.eup %2933 }
 0xaa4   :  { %v653_v41 = vadd.f32 1.0, %v2934_v40  ;;  %v2841_v40 = vpack.c.bf16 %v1128_v39, %v1127_v38 }
 0xaa6   :  { %2935 = vrcp.f32 %v653_v41 }
 0xab0   :  { %v2936_v42 = vpop.eup %2935 }
 0xb09   :  { %v659_v43 = vpop.permute.xlu0 %658 }
 0xb0a   :  { %v661_v44 = vmul.f32 %v2936_v42, %v659_v43  ;;  %v1136_v43 = vld [vmem:[#allocation3 + $0x8] sm:$0xff] }
 0xb0c   :  { %663 = vrot.lane.b32.xlu1 %v661_v44, %s3141_s2  ;;  %v1137_v44 = vld [vmem:[#allocation3 + $0x10] sm:$0xff] }
 0xb7e   :  { %v664_v45 = vpop.permute.xlu1 %663 }
 0xb7f   :  { %v666_v46 = vadd.f32 %v664_v45, %v206_v37 }
 0xb81   :  { %2937 = vtanh.f32 %v666_v46 }
 0xb8b   :  { %v2938_v47 = vpop.eup %2937 }
 0xb8c   :  { %v668_v48 = vsub.f32 %v568_v32, %v2938_v47  ;;  %v1126_v32 = vld [vmem:[%s3691_s5 + $0x8] sm:$0xff] }
 0xb8d   :  { %v2837_v33 = vpack.c.bf16 %v1126_v32, %v1125_v16 }
 0xb8e   :  { %670 = vrot.lane.b32.xlu0 %v668_v48, %s3144_s3 }
 0xc00   :  { %v671_v49 = vpop.permute.xlu0 %670 }
 0xc01   :  { %v673_v50 = vmul.f32 %v2936_v42, %v671_v49  ;;  %v1135_v42 = vld [vmem:[#allocation3] sm:$0xff] }
 0xc03   :  { %675 = vrot.lane.b32.xlu1 %v673_v50, %s3145_s16 }
 0xc75   :  { %v676_v51 = vpop.permute.xlu1 %675 }
 0xc76   :  { %v678_v52 = vadd.f32 %v2938_v47, %v676_v51 }
 0xc78   :  { %680 = vrot.lane.b32.xlu0 %v678_v52, %s3141_s2 }
 0xcea   :  { %v681_v53 = vpop.permute.xlu0 %680 }
 0xceb   :  { %684 = vst.msk [vmem:[#allocation3 + $0x18] sm:$0xff] %vm243_vm3, %v681_v53  ;;  %2626 = vmatmul.mubr.msk.f32.vlgmr.msra.gmra.mrb[6].mxu0 %vm243_vm3, %v681_v53 }
 0xcec   :  { %2827 = vmatpush3.bf16.msra.mxu0 %v3263_v6  ;;  %2647 = vmatprep.mubr.msk.f32.mxu0 %vm3142_vm2, %v3143_v15 }
 0xced   :  { %2828 = vmatprep.subr.bf16.mxu0 %v3140_v8 }
 0xcf0   :  { %2830 = vmatpush3.bf16.msra.mxu0 %v3285_v13 }
 0xcf1   :  { %2838 = vmatprep.subr.bf16.mxu0 %v2837_v33 }
 0xcf2   :  { %v1138_v45 = vld [vmem:[#allocation3 + $0x18] sm:$0xff] }
 0xdbe   :  { %v755_v54 = vpop.f32.mrb[6].mxu0 }
 0xdbf   :  { %v766_v55 = vadd.f32 %v755_v54, %v3320_v22  ;;  %v2627_v56 = vpop.f32.mrb[7].mxu0  ;;  %v759_v58 = vadd.f32 %v755_v54, %v211_v57 }
 0xdc1   :  { %768 = vrot.lane.b32.xlu1 %v766_v55, %s3141_s2  ;;  %v2397_v59 = vmul.f32 -1.442695, %v759_v58 }
 0xdc3   :  { %2939 = vpow2.f32 %v2397_v59 }
 0xdcd   :  { %v2940_v60 = vpop.eup %2939 }
 0xdce   :  { %v763_v61 = vadd.f32 1.0, %v2940_v60 }
 0xdd0   :  { %2941 = vrcp.f32 %v763_v61 }
 0xdda   :  { %v2942_v62 = vpop.eup %2941 }
 0xe33   :  { %v769_v63 = vpop.permute.xlu1 %768 }
 0xe34   :  { %v771_v0 = vmul.f32 %v2942_v62, %v769_v63 }
 0xe36   :  { %773 = vrot.lane.b32.xlu0 %v771_v0, %s3141_s2 }
 0xea8   :  { %v774_v1 = vpop.permute.xlu0 %773 }
 0xea9   :  { %v776_v2 = vadd.f32 %v774_v1, %v211_v57  ;;  %v221_v57 = vadd.f32 %v3327_v26, %v3318_v20 }
 0xeab   :  { %2943 = vtanh.f32 %v776_v2 }
 0xeb5   :  { %v2944_v3 = vpop.eup %2943 }
 0xeb6   :  { %v778_v4 = vsub.f32 %v678_v52, %v2944_v3 }
 0xeb8   :  { %780 = vrot.lane.b32.xlu1 %v778_v4, %s3144_s3 }
 0xf2a   :  { %v781_v5 = vpop.permute.xlu1 %780 }
 0xf2b   :  { %v783_v17 = vmul.f32 %v2942_v62, %v781_v5 }
 0xf2d   :  { %785 = vrot.lane.b32.xlu0 %v783_v17, %s3145_s16  ;;  %v1129_v17 = vld [vmem:[%s3692_s6] sm:$0xff] }
 0xf9f   :  { %v786_v7 = vpop.permute.xlu0 %785 }
 0xfa0   :  { %v788_v9 = vadd.f32 %v2944_v3, %v786_v7  ;;  %v1130_v7 = vld [vmem:[%s3692_s6 + $0x8] sm:$0xff] }
 0xfa2   :  { %790 = vrot.lane.b32.xlu1 %v788_v9, %s3141_s2 }
0x1014   :  { %v791_v10 = vpop.permute.xlu1 %790 }
0x1015   :  { %794 = vst.msk [vmem:[#allocation3 + $0x20] sm:$0xff] %vm243_vm3, %v791_v10  ;;  %2637 = vmatmul.mubr.msk.f32.vlgmr.msra.gmra.mrb[10].mxu1 %vm243_vm3, %v791_v10  ;;  %v1131_v10 = vld [vmem:[%s3692_s6 + $0x10] sm:$0xff] }
0x1016   :  { %2833 = vmatpush3.bf16.msra.mxu1 %v3263_v6  ;;  %2658 = vmatprep.mubr.msk.f32.mxu1 %vm3142_vm2, %v3143_v15 }
0x1017   :  { %2834 = vmatprep.subr.bf16.mxu1 %v3140_v8 }
0x101a   :  { %2836 = vmatpush3.bf16.msra.mxu1 %v3285_v13 }
0x101b   :  { %2845 = vmatprep.subr.bf16.mxu1 %v3140_v8 }
0x101c   :  { %v1139_v46 = vld [vmem:[#allocation3 + $0x20] sm:$0xff] }
0x10e8   :  { %v865_v11 = vpop.f32.mrb[10].mxu1 }
0x10e9   :  { %v876_v12 = vadd.f32 %v865_v11, %v3320_v22  ;;  %v2638_v14 = vpop.f32.mrb[11].mxu1  ;;  %v869_v21 = vadd.f32 %v865_v11, %v216_v19  ;;  %v1132_v11 = vld [vmem:[%s3692_s6 + $0x18] sm:$0xff] }
0x10ea   :  { %v2413_v14 = vld [vmem:[#allocation9] ss:$0 sm:$0xff] }
0x10eb   :  { %878 = vrot.lane.b32.xlu0 %v876_v12, %s3141_s2  ;;  %v2399_v6 = vmul.f32 -1.442695, %v869_v21  ;;  %v3476_v12 = vpack.c.bf16 %v1132_v11, %v1131_v10 }
0x10ed   :  { %2945 = vpow2.f32 %v2399_v6 }
0x10f7   :  { %v2946_v23 = vpop.eup %2945 }
0x10f8   :  { %v873_v24 = vadd.f32 1.0, %v2946_v23 }
0x10fa   :  { %2947 = vrcp.f32 %v873_v24 }
0x1104   :  { %v2948_v25 = vpop.eup %2947 }
0x115d   :  { %v879_v27 = vpop.permute.xlu0 %878 }
0x115e   :  { %v881_v13 = vmul.f32 %v2948_v25, %v879_v27 }
0x1160   :  { %883 = vrot.lane.b32.xlu1 %v881_v13, %s3141_s2 }
0x11d2   :  { %v884_v28 = vpop.permute.xlu1 %883 }
0x11d3   :  { %v886_v29 = vadd.f32 %v884_v28, %v216_v19 }
0x11d5   :  { %2949 = vtanh.f32 %v886_v29 }
0x11df   :  { %v2950_v30 = vpop.eup %2949 }
0x11e0   :  { %v888_v31 = vsub.f32 %v788_v9, %v2950_v30  ;;  %v3466_v9 = vpack.c.bf16 %v1130_v7, %v1129_v17 }
0x11e2   :  { %890 = vrot.lane.b32.xlu0 %v888_v31, %s3144_s3 }
0x1254   :  { %v891_v34 = vpop.permute.xlu0 %890 }
0x1255   :  { %v893_v35 = vmul.f32 %v2948_v25, %v891_v34 }
0x1257   :  { %895 = vrot.lane.b32.xlu1 %v893_v35, %s3145_s16 }
0x12c9   :  { %v896_v36 = vpop.permute.xlu1 %895 }
0x12ca   :  { %v898_v37 = vadd.f32 %v2950_v30, %v896_v36  ;;  %v3505_v30 = vld [vmem:[#allocation7] ss:$0 sm:$0xff] }
0x12cc   :  { %900 = vrot.lane.b32.xlu0 %v898_v37, %s3141_s2 }
0x133e   :  { %v901_v41 = vpop.permute.xlu0 %900 }
0x133f   :  { %904 = vst.msk [vmem:[#allocation3 + $0x28] sm:$0xff] %vm243_vm3, %v901_v41  ;;  %2648 = vmatmul.mubr.msk.f32.vlgmr.msra.gmra.mrb[8].mxu0 %vm243_vm3, %v901_v41 }
0x1340   :  { %2840 = vmatpush3.bf16.msra.mxu0 %v2837_v33  ;;  %2669 = vmatprep.mubr.msk.f32.mxu0 %vm243_vm3, %v1135_v42 }
0x1341   :  { %2842 = vmatprep.subr.bf16.mxu0 %v2841_v40 }
0x1344   :  { %2844 = vmatpush3.bf16.msra.mxu0 %v2841_v40 }
0x1345   :  { %2857 = vmatprep.subr.bf16.mxu0 %v3140_v8 }
0x1346   :  { %v1140_v47 = vld [vmem:[#allocation3 + $0x28] sm:$0xff] }
0x1347   :  { %2670 = vmatmul.mubr.msk.f32.vlgmr.msra.gmra.mrb[10].mxu0 %vm243_vm3, %v1136_v43 }
0x1348   :  { %2672 = vmatprep.mubr.msk.f32.mxu0 %vm243_vm3, %v1137_v44  ;;  %2859 = vmatpush3.bf16.msra.mxu0 %v3466_v9 }
0x1349   :  { %2860 = vmatprep.subr.bf16.mxu0 %v3140_v8 }
0x134b   :  { %2673 = vmatmul.mubr.msk.f32.gmra.mrb[12].mxu0 %vm243_vm3, %v1138_v45  ;;  %v226_v45 = vadd.f32 %v3316_v18, %v3327_v26 }
0x134c   :  { %2675 = vmatprep.mubr.msk.f32.mxu0 %vm243_vm3, %v1139_v46  ;;  %2862 = vmatpush3.bf16.msra.mxu0 %v3476_v12 }
0x134d   :  { %2869 = vmatprep.subr.bf16.mxu0 %v3140_v8 }
0x134f   :  { %2676 = vmatmul.mubr.msk.f32.gmra.mrb[14].mxu0 %vm243_vm3, %v1140_v47 }
0x1412   :  { %v975_v48 = vpop.f32.mrb[8].mxu0 }
0x1413   :  { %v986_v49 = vadd.f32 %v975_v48, %v3320_v22  ;;  %v2649_v50 = vpop.f32.mrb[9].mxu0  ;;  %v979_v58 = vadd.f32 %v975_v48, %v221_v57 }
0x1415   :  { %988 = vrot.lane.b32.xlu1 %v986_v49, %s3141_s2  ;;  %v2401_v59 = vmul.f32 -1.442695, %v979_v58 }
0x1417   :  { %2951 = vpow2.f32 %v2401_v59 }
0x141a   :  { %v3443_v51 = vpop.f32.mrb[10].mxu0 }
0x141b   :  { %v3445_v52 = vpop.f32.mrb[11].mxu0 }
0x141c   :  { %v1240_v31 = vadd.f32 %v3505_v30, %v3445_v52 }
0x141e   :  { %v3447_v53 = vpop.f32.mrb[12].mxu0 }
0x141f   :  { %v3449_v54 = vpop.f32.mrb[13].mxu0 }
0x1421   :  { %v2952_v60 = vpop.eup %2951 }
0x1422   :  { %v3451_v55 = vpop.f32.mrb[14].mxu0  ;;  %v983_v61 = vadd.f32 1.0, %v2952_v60 }
0x1423   :  { %v3453_v56 = vpop.f32.mrb[15].mxu0 }
0x1424   :  { %2953 = vrcp.f32 %v983_v61 }
0x142e   :  { %v2954_v62 = vpop.eup %2953 }
0x1487   :  { %v989_v63 = vpop.permute.xlu1 %988 }
0x1488   :  { %v991_v0 = vmul.f32 %v2954_v62, %v989_v63 }
0x148a   :  { %993 = vrot.lane.b32.xlu0 %v991_v0, %s3141_s2 }
0x14fc   :  { %v994_v1 = vpop.permute.xlu0 %993 }
0x14fd   :  { %v996_v2 = vadd.f32 %v994_v1, %v221_v57 }
0x14ff   :  { %2955 = vtanh.f32 %v996_v2 }
0x1509   :  { %v2956_v3 = vpop.eup %2955 }
0x150a   :  { %v998_v4 = vsub.f32 %v898_v37, %v2956_v3 }
0x150c   :  { %1000 = vrot.lane.b32.xlu1 %v998_v4, %s3144_s3 }
0x157e   :  { %v1001_v5 = vpop.permute.xlu1 %1000 }
0x157f   :  { %v1003_v20 = vmul.f32 %v2954_v62, %v1001_v5  ;;  %v1245_v5 = vadd.f32 %v3443_v51, %v3505_v30 }
0x1581   :  { %1005 = vrot.lane.b32.xlu0 %v1003_v20, %s3145_s16 }
0x1585   :  { %1369 = vrot.lane.b32.xlu0 %v2413_v14, %s3141_s2 }
0x15f3   :  { %v1006_v19 = vpop.permute.xlu0 %1005 }
0x15f4   :  { %v3481_v21 = vadd.f32 %v2956_v3, %v1006_v19 }
0x15f6   :  { %1010 = vrot.lane.b32.xlu1 %v3481_v21, %s3141_s2 }
0x15f7   :  { %v3501_v27 = vpop.permute.xlu0 %1369 }
0x1668   :  { %v1011_v6 = vpop.permute.xlu1 %1010 }
0x1669   :  { %1014 = vst.msk [vmem:[#allocation3 + $0x30] sm:$0xff] %vm243_vm3, %v1011_v6  ;;  %2659 = vmatmul.mubr.msk.f32.vlgmr.msra.gmra.mrb[12].mxu1 %vm243_vm3, %v1011_v6 }
0x166a   :  { %2847 = vmatpush3.bf16.msra.mxu1 %v3466_v9  ;;  %2689 = vmatprep.mubr.msk.f32.mxu1 %vm3142_vm2, %v3143_v15 }
0x166b   :  { %2848 = vmatprep.subr.bf16.mxu1 %v3140_v8 }
0x166e   :  { %2850 = vmatpush3.bf16.msra.mxu1 %v3476_v12 }
0x166f   :  { %2851 = vmatprep.subr.bf16.mxu1 %v3140_v8 }
0x1670   :  { %v1141_v23 = vld [vmem:[#allocation3 + $0x30] sm:$0xff] }
0x1671   :  { %2690 = vmatmul.mubr.f32.vlgmr.msra.gmra.mrb[14].mxu1 %v3143_v15  ;;  %2678 = vmatprep.mubr.msk.f32.mxu0 %vm243_vm3, %v1141_v23 }
0x1672   :  { %2853 = vmatpush3.bf16.msra.mxu1 %v3466_v9  ;;  %2700 = vmatprep.mubr.msk.f32.mxu1 %vm3142_vm2, %v3143_v15 }
0x1673   :  { %2854 = vmatprep.subr.bf16.mxu1 %v3140_v8 }
0x1676   :  { %2856 = vmatpush3.bf16.msra.mxu1 %v3476_v12 }
0x1677   :  { %2863 = vmatprep.subr.bf16.mxu1 %v3140_v8 }
0x173c   :  { %v1085_v24 = vpop.f32.mrb[12].mxu1 }
0x173d   :  { %v2660_v25 = vpop.f32.mrb[13].mxu1  ;;  %v1096_v44 = vadd.f32 %v1085_v24, %v3320_v22  ;;  %v1089_v46 = vadd.f32 %v1085_v24, %v226_v45 }
0x173f   :  { %v2403_v47 = vmul.f32 -1.442695, %v1089_v46 }
0x1744   :  { %v1358_v13 = vpop.f32.mrb[14].mxu1 }
0x1745   :  { %v1372_v28 = vadd.f32 %v3501_v27, %v1358_v13  ;;  %v2691_v29 = vpop.f32.mrb[15].mxu1  ;;  %v1362_v16 = vadd.f32 %v1358_v13, %v1240_v31 }
0x1747   :  { %1374 = vrot.lane.b32.xlu1 %v1372_v28, %s3141_s2  ;;  %v2414_v32 = vmul.f32 -1.442695, %v1362_v16 }
0x1749   :  { %2957 = vpow2.f32 %v2414_v32 }
0x1753   :  { %v2958_v33 = vpop.eup %2957 }
0x1754   :  { %v1366_v34 = vadd.f32 1.0, %v2958_v33 }
0x1756   :  { %2959 = vrcp.f32 %v1366_v34 }
0x1760   :  { %v2960_v35 = vpop.eup %2959 }
0x17b9   :  { %v1375_v36 = vpop.permute.xlu1 %1374 }
0x17ba   :  { %v1377_v37 = vmul.f32 %v2960_v35, %v1375_v36 }
0x17bc   :  { %1379 = vrot.lane.b32.xlu0 %v1377_v37, %s3141_s2  ;;  %v1250_v37 = vadd.f32 %v3505_v30, %v3449_v54 }
0x182e   :  { %v1380_v38 = vpop.permute.xlu0 %1379 }
0x182f   :  { %v1382_v39 = vadd.f32 %v1380_v38, %v1240_v31 }
0x1831   :  { %2961 = vtanh.f32 %v1382_v39 }
0x1832   :  { %2963 = vpow2.f32 %v2403_v47 }
0x183b   :  { %v2962_v40 = vpop.eup %2961 }
0x183c   :  { %v1384_v41 = vsub.f32 0.0, %v2962_v40  ;;  %v2964_v48 = vpop.eup %2963 }
0x183d   :  { %v1093_v49 = vadd.f32 1.0, %v2964_v48 }
0x183e   :  { %1386 = vrot.lane.b32.xlu1 %v1384_v41, %s3144_s3 }
0x183f   :  { %2965 = vrcp.f32 %v1093_v49 }
0x1849   :  { %v2966_v57 = vpop.eup %2965 }
0x18b0   :  { %v1387_v42 = vpop.permute.xlu1 %1386 }
0x18b1   :  { %v1389_v43 = vmul.f32 %v2960_v35, %v1387_v42 }
0x18b3   :  { %1391 = vrot.lane.b32.xlu0 %v1389_v43, %s3145_s16 }
0x18b7   :  { %1098 = vrot.lane.b32.xlu0 %v1096_v44, %s3141_s2 }
0x1925   :  { %v1392_v50 = vpop.permute.xlu0 %1391 }
0x1926   :  { %v1394_v52 = vadd.f32 %v2962_v40, %v1392_v50 }
0x1928   :  { %1396 = vrot.lane.b32.xlu1 %v1394_v52, %s3141_s2 }
0x1929   :  { %v1099_v58 = vpop.permute.xlu0 %1098 }
0x192a   :  { %v1101_v59 = vmul.f32 %v2966_v57, %v1099_v58 }
0x192c   :  { %1103 = vrot.lane.b32.xlu0 %v1101_v59, %s3141_s2 }
0x199a   :  { %v1397_v22 = vpop.permute.xlu1 %1396 }
0x199b   :  { %1399 = vst.msk [vmem:[#allocation3] sm:$0xff] %vm243_vm3, %v1397_v22  ;;  %2701 = vmatmul.mubr.msk.f32.vlgmr.msra.gmra.mrb[16].mxu1 %vm243_vm3, %v1397_v22 }
0x199c   :  { %2865 = vmatpush3.bf16.msra.mxu1 %v3466_v9  ;;  %2722 = vmatprep.mubr.msk.f32.mxu1 %vm3142_vm2, %v3143_v15 }
0x199d   :  { %2866 = vmatprep.subr.bf16.mxu1 %v3140_v8 }
0x199e   :  { %v1104_v18 = vpop.permute.xlu0 %1103 }
0x199f   :  { %v1106_v26 = vadd.f32 %v1104_v18, %v226_v45  ;;  %v1255_v18 = vadd.f32 %v3447_v53, %v3505_v30 }
0x19a0   :  { %2868 = vmatpush3.bf16.msra.mxu1 %v3476_v12 }
0x19a1   :  { %2967 = vtanh.f32 %v1106_v26  ;;  %2875 = vmatprep.subr.bf16.mxu1 %v3140_v8 }
0x19ab   :  { %v2968_v60 = vpop.eup %2967 }
0x19ac   :  { %v1108_v61 = vsub.f32 %v3481_v21, %v2968_v60 }
0x19ae   :  { %1110 = vrot.lane.b32.xlu0 %v1108_v61, %s3144_s3 }
0x1a20   :  { %v1111_v62 = vpop.permute.xlu0 %1110 }
0x1a21   :  { %v1113_v63 = vmul.f32 %v2966_v57, %v1111_v62 }
0x1a23   :  { %1115 = vrot.lane.b32.xlu0 %v1113_v63, %s3145_s16 }
0x1a6e   :  { %v1469_v0 = vpop.f32.mrb[16].mxu1 }
0x1a6f   :  { %v1480_v1 = vadd.f32 %v1469_v0, %v3501_v27  ;;  %v2702_v2 = vpop.f32.mrb[17].mxu1  ;;  %v1473_v20 = vadd.f32 %v1469_v0, %v1245_v5 }
0x1a71   :  { %1482 = vrot.lane.b32.xlu1 %v1480_v1, %s3141_s2  ;;  %v2416_v17 = vmul.f32 -1.442695, %v1473_v20 }
0x1a73   :  { %2969 = vpow2.f32 %v2416_v17 }
0x1a7d   :  { %v2970_v7 = vpop.eup %2969 }
0x1a7e   :  { %v1477_v10 = vadd.f32 1.0, %v2970_v7 }
0x1a80   :  { %2971 = vrcp.f32 %v1477_v10 }
0x1a8a   :  { %v2972_v11 = vpop.eup %2971 }
0x1a95   :  { %v1116_v3 = vpop.permute.xlu0 %1115 }
0x1a96   :  { %v1118_v4 = vadd.f32 %v2968_v60, %v1116_v3 }
0x1a98   :  { %1120 = vrot.lane.b32.xlu0 %v1118_v4, %s3141_s2 }
0x1ae3   :  { %v1483_v14 = vpop.permute.xlu1 %1482 }
0x1ae4   :  { %v1485_v19 = vmul.f32 %v2972_v11, %v1483_v14 }
0x1ae6   :  { %1487 = vrot.lane.b32.xlu1 %v1485_v19, %s3141_s2 }
0x1b0a   :  { %v1121_v21 = vpop.permute.xlu0 %1120 }
0x1b0b   :  { %1124 = vst.msk [vmem:[#allocation3 + $0x38] sm:$0xff] %vm243_vm3, %v1121_v21  ;;  %v1260_v21 = vadd.f32 %v3505_v30, %v3453_v56 }
0x1b12   :  { %v1142_v6 = vld [vmem:[#allocation3 + $0x38] sm:$0xff] }
0x1b13   :  { %2679 = vmatmul.mubr.msk.f32.gmra.mrb[16].mxu0 %vm243_vm3, %v1142_v6 }
0x1b14   :  { %2711 = vmatprep.mubr.msk.f32.mxu0 %vm3142_vm2, %v3143_v15 }
0x1b58   :  { %v1488_v51 = vpop.permute.xlu1 %1487 }
0x1b59   :  { %v1490_v23 = vadd.f32 %v1488_v51, %v1245_v5 }
0x1b5b   :  { %2973 = vtanh.f32 %v1490_v23 }
0x1b65   :  { %v2974_v24 = vpop.eup %2973 }
0x1b66   :  { %v1492_v25 = vsub.f32 %v1394_v52, %v2974_v24 }
0x1b68   :  { %1494 = vrot.lane.b32.xlu1 %v1492_v25, %s3144_s3 }
0x1bda   :  { %v1495_v13 = vpop.permute.xlu1 %1494 }
0x1bdb   :  { %v1497_v28 = vmul.f32 %v2972_v11, %v1495_v13 }
0x1bdd   :  { %1499 = vrot.lane.b32.xlu1 %v1497_v28, %s3145_s16 }
0x1be6   :  { %v3541_v29 = vpop.f32.mrb[16].mxu0 }
0x1be7   :  { %v3543_v31 = vpop.f32.mrb[17].mxu0 }
0x1c4f   :  { %v1500_v16 = vpop.permute.xlu1 %1499 }
0x1c50   :  { %v1502_v32 = vadd.f32 %v2974_v24, %v1500_v16 }
0x1c52   :  { %1504 = vrot.lane.b32.xlu1 %v1502_v32, %s3141_s2 }
0x1cc4   :  { %v1505_v33 = vpop.permute.xlu1 %1504 }
0x1cc5   :  { %1507 = vst.msk [vmem:[#allocation3 + $0x8] sm:$0xff] %vm243_vm3, %v1505_v33  ;;  %2712 = vmatmul.mubr.msk.f32.vlgmr.msra.gmra.mrb[18].mxu0 %vm243_vm3, %v1505_v33 }
0x1cc6   :  { %2871 = vmatpush3.bf16.msra.mxu0 %v3466_v9  ;;  %2733 = vmatprep.mubr.msk.f32.mxu0 %vm3142_vm2, %v3143_v15 }
0x1cc7   :  { %2872 = vmatprep.subr.bf16.mxu0 %v3140_v8 }
0x1cca   :  { %2874 = vmatpush3.bf16.msra.mxu0 %v3476_v12 }
0x1ccb   :  { %2881 = vmatprep.subr.bf16.mxu0 %v3140_v8 }
0x1d98   :  { %v1577_v34 = vpop.f32.mrb[18].mxu0 }
0x1d99   :  { %v1588_v35 = vadd.f32 %v1577_v34, %v3501_v27  ;;  %v2713_v36 = vpop.f32.mrb[19].mxu0  ;;  %v1581_v38 = vadd.f32 %v1577_v34, %v1250_v37 }
0x1d9b   :  { %1590 = vrot.lane.b32.xlu0 %v1588_v35, %s3141_s2  ;;  %v2418_v39 = vmul.f32 -1.442695, %v1581_v38 }
0x1d9d   :  { %2975 = vpow2.f32 %v2418_v39 }
0x1da7   :  { %v2976_v40 = vpop.eup %2975 }
0x1da8   :  { %v1585_v41 = vadd.f32 1.0, %v2976_v40 }
0x1daa   :  { %2977 = vrcp.f32 %v1585_v41 }
0x1db4   :  { %v2978_v42 = vpop.eup %2977 }
0x1e0d   :  { %v1591_v43 = vpop.permute.xlu0 %1590 }
0x1e0e   :  { %v1593_v44 = vmul.f32 %v2978_v42, %v1591_v43 }
0x1e10   :  { %1595 = vrot.lane.b32.xlu1 %v1593_v44, %s3141_s2 }
0x1e82   :  { %v1596_v45 = vpop.permute.xlu1 %1595 }
0x1e83   :  { %v1598_v46 = vadd.f32 %v1596_v45, %v1250_v37 }
0x1e85   :  { %2979 = vtanh.f32 %v1598_v46 }
0x1e8f   :  { %v2980_v47 = vpop.eup %2979 }
0x1e90   :  { %v1600_v48 = vsub.f32 %v1502_v32, %v2980_v47 }
0x1e92   :  { %1602 = vrot.lane.b32.xlu0 %v1600_v48, %s3144_s3 }
0x1f04   :  { %v1603_v49 = vpop.permute.xlu0 %1602 }
0x1f05   :  { %v1605_v54 = vmul.f32 %v2978_v42, %v1603_v49  ;;  %v1265_v42 = vadd.f32 %v3451_v55, %v3505_v30  ;;  %v2156_v55 = vld [vmem:[%s3695_s9] sm:$0xff] }
0x1f07   :  { %1607 = vrot.lane.b32.xlu1 %v1605_v54, %s3145_s16  ;;  %v2157_v54 = vld [vmem:[%s3695_s9 + $0x8] sm:$0xff] }
0x1f79   :  { %v1608_v50 = vpop.permute.xlu1 %1607 }
0x1f7a   :  { %v1610_v52 = vadd.f32 %v2980_v47, %v1608_v50  ;;  %v2893_v50 = vpack.c.bf16 %v2157_v54, %v2156_v55 }
0x1f7c   :  { %1612 = vrot.lane.b32.xlu0 %v1610_v52, %s3141_s2 }
0x1fee   :  { %v1613_v57 = vpop.permute.xlu0 %1612 }
0x1fef   :  { %1615 = vst.msk [vmem:[#allocation3 + $0x10] sm:$0xff] %vm243_vm3, %v1613_v57  ;;  %2723 = vmatmul.mubr.msk.f32.vlgmr.msra.gmra.mrb[18].mxu1 %vm243_vm3, %v1613_v57 }
0x1ff0   :  { %2877 = vmatpush3.bf16.msra.mxu1 %v3466_v9  ;;  %2744 = vmatprep.mubr.msk.f32.mxu1 %vm3142_vm2, %v3143_v15 }
0x1ff1   :  { %2878 = vmatprep.subr.bf16.mxu1 %v3140_v8 }
0x1ff4   :  { %2880 = vmatpush3.bf16.msra.mxu1 %v3476_v12 }
0x1ff5   :  { %2887 = vmatprep.subr.bf16.mxu1 %v3140_v8 }
0x20c2   :  { %v1685_v58 = vpop.f32.mrb[18].mxu1 }
0x20c3   :  { %v1696_v59 = vadd.f32 %v1685_v58, %v3501_v27  ;;  %v2724_v22 = vpop.f32.mrb[19].mxu1  ;;  %v1689_v26 = vadd.f32 %v1685_v58, %v1255_v18 }
0x20c4   :  { %v2158_v22 = vld [vmem:[%s3695_s9 + $0x10] sm:$0xff] }
0x20c5   :  { %1698 = vrot.lane.b32.xlu1 %v1696_v59, %s3141_s2  ;;  %v2420_v60 = vmul.f32 -1.442695, %v1689_v26 }
0x20c7   :  { %2981 = vpow2.f32 %v2420_v60 }
0x20d1   :  { %v2982_v61 = vpop.eup %2981 }
0x20d2   :  { %v1693_v62 = vadd.f32 1.0, %v2982_v61  ;;  %v2161_v61 = vld [vmem:[#allocation3] sm:$0xff] }
0x20d4   :  { %2983 = vrcp.f32 %v1693_v62  ;;  %v2162_v62 = vld [vmem:[#allocation3 + $0x8] sm:$0xff] }
0x20de   :  { %v2984_v63 = vpop.eup %2983 }
0x2137   :  { %v1699_v0 = vpop.permute.xlu1 %1698 }
0x2138   :  { %v1701_v1 = vmul.f32 %v2984_v63, %v1699_v0 }
0x213a   :  { %1703 = vrot.lane.b32.xlu0 %v1701_v1, %s3141_s2 }
0x21ac   :  { %v1704_v2 = vpop.permute.xlu0 %1703 }
0x21ad   :  { %v1706_v3 = vadd.f32 %v1704_v2, %v1255_v18  ;;  %v2159_v18 = vld [vmem:[%s3695_s9 + $0x18] sm:$0xff] }
0x21ae   :  { %v2897_v26 = vpack.c.bf16 %v2159_v18, %v2158_v22 }
0x21af   :  { %2985 = vtanh.f32 %v1706_v3 }
0x21b9   :  { %v2986_v4 = vpop.eup %2985 }
0x21ba   :  { %v1708_v5 = vsub.f32 %v1610_v52, %v2986_v4 }
0x21bc   :  { %1710 = vrot.lane.b32.xlu1 %v1708_v5, %s3144_s3 }
0x222e   :  { %v1711_v20 = vpop.permute.xlu1 %1710 }
0x222f   :  { %v1713_v53 = vmul.f32 %v2984_v63, %v1711_v20  ;;  %v2163_v63 = vld [vmem:[#allocation3 + $0x10] sm:$0xff]  ;;  %v3636_v20 = vld [vmem:[%s3696_s10] ss:$0 sm:$0xff]  ;;  %s3146_s10 = smov [#allocation10]  }
0x2231   :  { %1715 = vrot.lane.b32.xlu0 %v1713_v53, %s3145_s16 }
0x22a3   :  { %v1716_v17 = vpop.permute.xlu0 %1715 }
0x22a4   :  { %v1718_v7 = vadd.f32 %v2986_v4, %v1716_v17 }
0x22a6   :  { %1720 = vrot.lane.b32.xlu1 %v1718_v7, %s3141_s2 }
0x2318   :  { %v1721_v10 = vpop.permute.xlu1 %1720 }
0x2319   :  { %1723 = vst.msk [vmem:[#allocation3 + $0x18] sm:$0xff] %vm243_vm3, %v1721_v10  ;;  %2734 = vmatmul.mubr.msk.f32.vlgmr.msra.gmra.mrb[20].mxu0 %vm243_vm3, %v1721_v10 }
0x231a   :  { %2883 = vmatpush3.bf16.msra.mxu0 %v3466_v9  ;;  %2755 = vmatprep.mubr.msk.f32.mxu0 %vm3142_vm2, %v3143_v15 }
0x231b   :  { %2884 = vmatprep.subr.bf16.mxu0 %v3140_v8 }
0x231e   :  { %2886 = vmatpush3.bf16.msra.mxu0 %v3476_v12 }
0x231f   :  { %2894 = vmatprep.subr.bf16.mxu0 %v2893_v50 }
0x2320   :  { %v2164_v0 = vld [vmem:[#allocation3 + $0x18] sm:$0xff] }
0x23ec   :  { %v1793_v11 = vpop.f32.mrb[20].mxu0 }
0x23ed   :  { %v1804_v14 = vadd.f32 %v1793_v11, %v3501_v27  ;;  %v2735_v19 = vpop.f32.mrb[21].mxu0  ;;  %v1797_v6 = vadd.f32 %v1793_v11, %v1260_v21 }
0x23ef   :  { %1806 = vrot.lane.b32.xlu0 %v1804_v14, %s3141_s2  ;;  %v2422_v51 = vmul.f32 -1.442695, %v1797_v6 }
0x23f1   :  { %2987 = vpow2.f32 %v2422_v51 }
0x23fb   :  { %v2988_v23 = vpop.eup %2987 }
0x23fc   :  { %v1801_v24 = vadd.f32 1.0, %v2988_v23 }
0x23fe   :  { %2989 = vrcp.f32 %v1801_v24 }
0x2408   :  { %v2990_v25 = vpop.eup %2989 }
0x2461   :  { %v1807_v13 = vpop.permute.xlu0 %1806 }
0x2462   :  { %v1809_v28 = vmul.f32 %v2990_v25, %v1807_v13 }
0x2464   :  { %1811 = vrot.lane.b32.xlu1 %v1809_v28, %s3141_s2 }
0x24d6   :  { %v1812_v16 = vpop.permute.xlu1 %1811 }
0x24d7   :  { %v1814_v32 = vadd.f32 %v1812_v16, %v1260_v21 }
0x24d9   :  { %2991 = vtanh.f32 %v1814_v32 }
0x24e3   :  { %v2992_v33 = vpop.eup %2991 }
0x24e4   :  { %v1816_v34 = vsub.f32 %v1718_v7, %v2992_v33 }
0x24e6   :  { %1818 = vrot.lane.b32.xlu0 %v1816_v34, %s3144_s3 }
0x2558   :  { %v1819_v35 = vpop.permute.xlu0 %1818 }
0x2559   :  { %v1821_v56 = vmul.f32 %v2990_v25, %v1819_v35 }
0x255b   :  { %1823 = vrot.lane.b32.xlu1 %v1821_v56, %s3145_s16 }
0x25cd   :  { %v1824_v36 = vpop.permute.xlu1 %1823 }
0x25ce   :  { %v1826_v37 = vadd.f32 %v2992_v33, %v1824_v36 }
0x25d0   :  { %1828 = vrot.lane.b32.xlu0 %v1826_v37, %s3141_s2 }
0x2642   :  { %v1829_v38 = vpop.permute.xlu0 %1828 }
0x2643   :  { %1831 = vst.msk [vmem:[#allocation3 + $0x20] sm:$0xff] %vm243_vm3, %v1829_v38  ;;  %2745 = vmatmul.mubr.msk.f32.vlgmr.msra.gmra.mrb[20].mxu1 %vm243_vm3, %v1829_v38 }
0x2644   :  { %2889 = vmatpush3.bf16.msra.mxu1 %v3466_v9  ;;  %2766 = vmatprep.mubr.msk.f32.mxu1 %vm3142_vm2, %v3143_v15 }
0x2645   :  { %2890 = vmatprep.subr.bf16.mxu1 %v3140_v8 }
0x2648   :  { %2892 = vmatpush3.bf16.msra.mxu1 %v3476_v12 }
0x264a   :  { %v2165_v1 = vld [vmem:[#allocation3 + $0x20] sm:$0xff] }
0x2716   :  { %v1901_v39 = vpop.f32.mrb[20].mxu1 }
0x2717   :  { %v1912_v40 = vadd.f32 %v1901_v39, %v3501_v27  ;;  %v2746_v41 = vpop.f32.mrb[21].mxu1  ;;  %v1905_v43 = vadd.f32 %v1901_v39, %v1265_v42 }
0x2719   :  { %1914 = vrot.lane.b32.xlu1 %v1912_v40, %s3141_s2  ;;  %v2424_v44 = vmul.f32 -1.442695, %v1905_v43 }
0x271b   :  { %2993 = vpow2.f32 %v2424_v44 }
0x2725   :  { %v2994_v9 = vpop.eup %2993 }
0x2726   :  { %v1909_v45 = vadd.f32 1.0, %v2994_v9 }
0x2728   :  { %2995 = vrcp.f32 %v1909_v45 }
0x2732   :  { %v2996_v15 = vpop.eup %2995 }
0x278b   :  { %v1915_v46 = vpop.permute.xlu1 %1914 }
0x278c   :  { %v1917_v8 = vmul.f32 %v2996_v15, %v1915_v46 }
0x278e   :  { %1919 = vrot.lane.b32.xlu0 %v1917_v8, %s3141_s2 }
0x2800   :  { %v1920_v12 = vpop.permute.xlu0 %1919 }
0x2801   :  { %v1922_v47 = vadd.f32 %v1920_v12, %v1265_v42 }
0x2803   :  { %2997 = vtanh.f32 %v1922_v47  ;;  %v1270_v47 = vadd.f32 %v3505_v30, %v3543_v31 }
0x280d   :  { %v2998_v48 = vpop.eup %2997 }
0x280e   :  { %v1924_v49 = vsub.f32 %v1826_v37, %v2998_v48 }
0x2810   :  { %1926 = vrot.lane.b32.xlu1 %v1924_v49, %s3144_s3 }
0x2882   :  { %v1927_v52 = vpop.permute.xlu1 %1926 }
0x2883   :  { %v1929_v57 = vmul.f32 %v2996_v15, %v1927_v52 }
0x2885   :  { %1931 = vrot.lane.b32.xlu0 %v1929_v57, %s3145_s16 }
0x28f7   :  { %v1932_v58 = vpop.permute.xlu0 %1931 }
0x28f8   :  { %v3613_v59 = vadd.f32 %v2998_v48, %v1932_v58 }
0x28fa   :  { %1936 = vrot.lane.b32.xlu1 %v3613_v59, %s3141_s2 }
0x296c   :  { %v1937_v60 = vpop.permute.xlu1 %1936 }
0x296d   :  { %1939 = vst.msk [vmem:[#allocation3 + $0x28] sm:$0xff] %vm243_vm3, %v1937_v60  ;;  %2756 = vmatmul.mubr.msk.f32.vlgmr.msra.gmra.mrb[22].mxu0 %vm243_vm3, %v1937_v60 }
0x296e   :  { %2896 = vmatpush3.bf16.msra.mxu0 %v2893_v50  ;;  %2777 = vmatprep.mubr.msk.f32.mxu0 %vm243_vm3, %v2161_v61 }
0x296f   :  { %2898 = vmatprep.subr.bf16.mxu0 %v2897_v26 }
0x2972   :  { %2900 = vmatpush3.bf16.msra.mxu0 %v2897_v26 }
0x2974   :  { %v2166_v2 = vld [vmem:[#allocation3 + $0x28] sm:$0xff] }
0x2975   :  { %2778 = vmatmul.mubr.msk.f32.vlgmr.msra.gmra.mrb[24].mxu0 %vm243_vm3, %v2162_v62 }
0x2976   :  { %2780 = vmatprep.mubr.msk.f32.mxu0 %vm243_vm3, %v2163_v63 }
0x2979   :  { %2781 = vmatmul.mubr.msk.f32.gmra.mrb[26].mxu0 %vm243_vm3, %v2164_v0 }
0x297a   :  { %2783 = vmatprep.mubr.msk.f32.mxu0 %vm243_vm3, %v2165_v1 }
0x297d   :  { %2784 = vmatmul.mubr.msk.f32.gmra.mrb[28].mxu0 %vm243_vm3, %v2166_v2 }
0x2a40   :  { %v2009_v3 = vpop.f32.mrb[22].mxu0 }
0x2a41   :  { %v2020_v4 = vadd.f32 %v2009_v3, %v3501_v27  ;;  %v2757_v5 = vpop.f32.mrb[23].mxu0  ;;  %v2013_v48 = vadd.f32 %v2009_v3, %v1270_v47  ;;  %v1275_v3 = vadd.f32 %v3541_v29, %v3505_v30 }
0x2a43   :  { %2022 = vrot.lane.b32.xlu0 %v2020_v4, %s3141_s2  ;;  %v2426_v49 = vmul.f32 -1.442695, %v2013_v48 }
0x2a48   :  { %v2779_v53 = vpop.f32.mrb[24].mxu0 }
0x2a49   :  { %v2271_v17 = vadd.f32 %v2779_v53, %v3636_v20  ;;  %v2265_v7 = vpop.f32.mrb[25].mxu0 }
0x2a4a   :  { %v2266_v10 = vadd.f32 %v3636_v20, %v2265_v7 }
0x2a4b   :  { %v2439_v11 = vmul.f32 -1.442695, %v2271_v17 }
0x2a4c   :  { %v2438_v14 = vmul.f32 -1.442695, %v2266_v10  ;;  %v2782_v19 = vpop.f32.mrb[26].mxu0 }
0x2a4d   :  { %2999 = vpow2.f32 %v2439_v11  ;;  %v2281_v21 = vadd.f32 %v2782_v19, %v3636_v20  ;;  %v2275_v6 = vpop.f32.mrb[27].mxu0 }
0x2a4e   :  { %3001 = vpow2.f32 %v2438_v14  ;;  %v2276_v51 = vadd.f32 %v3636_v20, %v2275_v6 }
0x2a4f   :  { %v2441_v23 = vmul.f32 -1.442695, %v2281_v21 }
0x2a50   :  { %v2440_v24 = vmul.f32 -1.442695, %v2276_v51  ;;  %v2785_v25 = vpop.f32.mrb[28].mxu0 }
0x2a51   :  { %3003 = vpow2.f32 %v2441_v23  ;;  %v2291_v13 = vadd.f32 %v2785_v25, %v3636_v20  ;;  %v2285_v28 = vpop.f32.mrb[29].mxu0 }
0x2a52   :  { %v2286_v16 = vadd.f32 %v3636_v20, %v2285_v28  ;;  %3005 = vpow2.f32 %v2440_v24 }
0x2a53   :  { %v2443_v32 = vmul.f32 -1.442695, %v2291_v13 }
0x2a54   :  { %v2442_v33 = vmul.f32 -1.442695, %v2286_v16 }
0x2a55   :  { %3007 = vpow2.f32 %v2443_v32 }
0x2a56   :  { %3009 = vpow2.f32 %v2442_v33 }
0x2a57   :  { %v3000_v34 = vpop.eup %2999 }
0x2a58   :  { %v3002_v35 = vpop.eup %3001  ;;  %v2329_v56 = vadd.f32 1.0, %v3000_v34 }
0x2a59   :  { %v2328_v36 = vadd.f32 1.0, %v3002_v35 }
0x2a5a   :  { %3011 = vrcp.f32 %v2329_v56 }
0x2a5b   :  { %v3004_v37 = vpop.eup %3003  ;;  %3013 = vrcp.f32 %v2328_v36 }
0x2a5c   :  { %v2331_v38 = vadd.f32 1.0, %v3004_v37  ;;  %v3006_v39 = vpop.eup %3005 }
0x2a5d   :  { %v2330_v40 = vadd.f32 1.0, %v3006_v39 }
0x2a5e   :  { %3015 = vrcp.f32 %v2331_v38 }
0x2a5f   :  { %v3008_v41 = vpop.eup %3007  ;;  %3017 = vrcp.f32 %v2330_v40 }
0x2a60   :  { %v3010_v42 = vpop.eup %3009  ;;  %v2333_v43 = vadd.f32 1.0, %v3008_v41 }
0x2a61   :  { %v2332_v44 = vadd.f32 1.0, %v3010_v42 }
0x2a62   :  { %3019 = vrcp.f32 %v2333_v43 }
0x2a63   :  { %3021 = vrcp.f32 %v2332_v44 }
0x2a64   :  { %v3012_v9 = vpop.eup %3011  ;;  %3023 = vpow2.f32 %v2426_v49 }
0x2a65   :  { %v3014_v45 = vpop.eup %3013  ;;  %2353 = vst.msk [vmem:[#allocation10 + $0x8] sm:$0xff] %vm243_vm3, %v3012_v9 }
0x2a66   :  { %2352 = vst.msk [vmem:[#allocation10] sm:$0xff] %vm243_vm3, %v3014_v45 }
0x2a68   :  { %v3016_v15 = vpop.eup %3015 }
0x2a69   :  { %2355 = vst.msk [vmem:[#allocation10 + $0x18] sm:$0xff] %vm243_vm3, %v3016_v15  ;;  %v3018_v46 = vpop.eup %3017 }
0x2a6a   :  { %2354 = vst.msk [vmem:[#allocation10 + $0x10] sm:$0xff] %vm243_vm3, %v3018_v46 }
0x2a6c   :  { %v3020_v8 = vpop.eup %3019 }
0x2a6d   :  { %v3022_v12 = vpop.eup %3021  ;;  %2357 = vst.msk [vmem:[#allocation10 + $0x28] sm:$0xff] %vm243_vm3, %v3020_v8 }
0x2a6e   :  { %2356 = vst.msk [vmem:[#allocation10 + $0x20] sm:$0xff] %vm243_vm3, %v3022_v12  ;;  %v3024_v55 = vpop.eup %3023 }
0x2a6f   :  { %v2017_v54 = vadd.f32 1.0, %v3024_v55 }
0x2a71   :  { %3025 = vrcp.f32 %v2017_v54 }
0x2a7b   :  { %v3026_v50 = vpop.eup %3025 }
0x2ab5   :  { %v2023_v52 = vpop.permute.xlu0 %2022 }
0x2ab6   :  { %v2025_v57 = vmul.f32 %v3026_v50, %v2023_v52 }
0x2ab8   :  { %2027 = vrot.lane.b32.xlu1 %v2025_v57, %s3141_s2 }
0x2b2a   :  { %v2028_v58 = vpop.permute.xlu1 %2027 }
0x2b2b   :  { %v2030_v22 = vadd.f32 %v2028_v58, %v1270_v47 }
0x2b2d   :  { %3027 = vtanh.f32 %v2030_v22 }
0x2b37   :  { %v3028_v18 = vpop.eup %3027 }
0x2b38   :  { %v2032_v26 = vsub.f32 %v3613_v59, %v3028_v18 }
0x2b3a   :  { %2034 = vrot.lane.b32.xlu0 %v2032_v26, %s3144_s3 }
0x2bac   :  { %v2035_v31 = vpop.permute.xlu0 %2034 }
0x2bad   :  { %v2037_v60 = vmul.f32 %v3026_v50, %v2035_v31 }
0x2baf   :  { %2039 = vrot.lane.b32.xlu1 %v2037_v60, %s3145_s16 }
0x2c21   :  { %v2040_v61 = vpop.permute.xlu1 %2039 }
0x2c22   :  { %v2042_v62 = vadd.f32 %v3028_v18, %v2040_v61 }
0x2c24   :  { %2044 = vrot.lane.b32.xlu0 %v2042_v62, %s3141_s2 }
0x2c96   :  { %v2045_v63 = vpop.permute.xlu0 %2044 }
0x2c97   :  { %2047 = vst.msk [vmem:[#allocation3 + $0x30] sm:$0xff] %vm243_vm3, %v2045_v63  ;;  %2767 = vmatmul.mubr.msk.f32.vlgmr.msra.gmra.mrb[22].mxu1 %vm243_vm3, %v2045_v63 }
0x2c9e   :  { %v2167_v0 = vld [vmem:[#allocation3 + $0x30] sm:$0xff] }
0x2c9f   :  { %2786 = vmatprep.mubr.msk.f32.mxu0 %vm243_vm3, %v2167_v0 }
0x2d6a   :  { %v2117_v1 = vpop.f32.mrb[22].mxu1 }
0x2d6b   :  { %v2128_v59 = vadd.f32 %v2117_v1, %v3501_v27  ;;  %v2768_v2 = vpop.f32.mrb[23].mxu1  ;;  %v2121_v4 = vadd.f32 %v2117_v1, %v1275_v3 }
0x2d6d   :  { %2130 = vrot.lane.b32.xlu1 %v2128_v59, %s3141_s2  ;;  %v2428_v5 = vmul.f32 -1.442695, %v2121_v4 }
0x2d6f   :  { %3029 = vpow2.f32 %v2428_v5 }
0x2d79   :  { %v3030_v53 = vpop.eup %3029 }
0x2d7a   :  { %v2125_v17 = vadd.f32 1.0, %v3030_v53 }
0x2d7c   :  { %3031 = vrcp.f32 %v2125_v17 }
0x2d86   :  { %v3032_v7 = vpop.eup %3031 }
0x2ddf   :  { %v2131_v10 = vpop.permute.xlu1 %2130 }
0x2de0   :  { %v2133_v11 = vmul.f32 %v3032_v7, %v2131_v10 }
0x2de2   :  { %2135 = vrot.lane.b32.xlu0 %v2133_v11, %s3141_s2 }
0x2e54   :  { %v2136_v14 = vpop.permute.xlu0 %2135 }
0x2e55   :  { %v2138_v19 = vadd.f32 %v2136_v14, %v1275_v3 }
0x2e57   :  { %3033 = vtanh.f32 %v2138_v19 }
0x2e61   :  { %v3034_v27 = vpop.eup %3033 }
0x2e62   :  { %v2140_v21 = vsub.f32 %v2042_v62, %v3034_v27 }
0x2e64   :  { %2142 = vrot.lane.b32.xlu1 %v2140_v21, %s3144_s3 }
0x2ed6   :  { %v2143_v6 = vpop.permute.xlu1 %2142 }
0x2ed7   :  { %v2145_v30 = vmul.f32 %v3032_v7, %v2143_v6 }
0x2ed9   :  { %2147 = vrot.lane.b32.xlu0 %v2145_v30, %s3145_s16 }
0x2f4b   :  { %v2148_v29 = vpop.permute.xlu0 %2147 }
0x2f4c   :  { %v2150_v51 = vadd.f32 %v3034_v27, %v2148_v29 }
0x2f4e   :  { %2152 = vrot.lane.b32.xlu1 %v2150_v51, %s3141_s2  ;;  %s2365_s2 = sshll.u32 %s3146_s10, 4  ;;  %s2366_s2 = int_to_ptr.vmem [resolvable:$true] %s2365_s2 }
0x2f4f   :  { %s3109_s3 = scalar_lea.vmem %s2366_s2, 1024  ;;  %p3114_p11 = scmp.lt.s32.totalorder %s2366_s2, %s2366_s2 }
0x2f50   :  { %p3110_p10 = scmp.ne.s32.totalorder %s2366_s2, %s3109_s3  ;;  %p3115_p12 = scmp.lt.s32.totalorder %s3109_s3, %s3109_s3 }
0x2f52   :  { %p3116_p13 = por %p3115_p12, %p3114_p11 }
0x2f54   :  { %p3117_p0 = pnand %p3116_p13, %p3110_p10 }
0x2fc0   :  { %v2153_v23 = vpop.permute.xlu1 %2152 }
0x2fc1   :  { %2155 = vst.msk [vmem:[#allocation3 + $0x38] sm:$0xff] %vm243_vm3, %v2153_v23 }
0x2fc8   :  { %v2168_v24 = vld [vmem:[#allocation3 + $0x38] sm:$0xff] }
0x2fc9   :  { %2787 = vmatmul.mubr.msk.f32.gmra.mrb[30].mxu0 %vm243_vm3, %v2168_v24 }
0x309c   :  { %v2788_v25 = vpop.f32.mrb[30].mxu0 }
0x309d   :  { %v2301_v13 = vadd.f32 %v2788_v25, %v3636_v20  ;;  %v2295_v28 = vpop.f32.mrb[31].mxu0 }
0x309e   :  { %v2296_v16 = vadd.f32 %v3636_v20, %v2295_v28 }
0x309f   :  { %v2445_v32 = vmul.f32 -1.442695, %v2301_v13 }
0x30a0   :  { %v2444_v33 = vmul.f32 -1.442695, %v2296_v16 }
0x30a1   :  { %3035 = vpow2.f32 %v2445_v32 }
0x30a2   :  { %3037 = vpow2.f32 %v2444_v33 }
0x30ab   :  { %v3036_v34 = vpop.eup %3035 }
0x30ac   :  { %v3038_v35 = vpop.eup %3037  ;;  %v2335_v56 = vadd.f32 1.0, %v3036_v34 }
0x30ad   :  { %v2334_v36 = vadd.f32 1.0, %v3038_v35 }
0x30ae   :  { %3039 = vrcp.f32 %v2335_v56 }
0x30af   :  { %3041 = vrcp.f32 %v2334_v36 }
0x30b8   :  { %v3040_v37 = vpop.eup %3039 }
0x30b9   :  { %v3042_v38 = vpop.eup %3041  ;;  %2359 = vst.msk [vmem:[#allocation10 + $0x38] sm:$0xff] %vm243_vm3, %v3040_v37 }
0x30ba   :  { %2358 = vst.msk [vmem:[#allocation10 + $0x30] sm:$0xff] %vm243_vm3, %v3042_v38 }
0x30bb   :  { %3120 = shalt.err (!%p3117_p0)
}
0x30bc   :  { %s3121_s22 = scalar_lea.hbm %s3697_s11, 1024 }
0x30bd   :  { %p3122_p1 = scmp.ne.s32.totalorder %s3697_s11, %s3121_s22  ;;  %p3125_p2 = scmp.lt.u32.totalorder %s3121_s22, %s3697_s11 }
0x30bf   :  { %p3127_p3 = pnand %p3125_p2, %p3122_p1 }
0x30c1   :  { %3130 = shalt.err (!%p3127_p3)
}
0x30c2   :  { %s3147_s25 = smov 128   ;;  %s3148_s26 = smov 8  }
0x30c3   :  { %2371 = dma.vmem_to_hbm [thread:$0]  %s2366_s2, 1024, %s3697_s11, [#allocation6], %s3147_s25, %s3147_s25, %s3148_s26  }
0x30c4   :  { %3135 = dma.done.wait [#allocation6], 1024  }
0x30c5   :  { %3136 = vsyncadd [#allocation6], 4294966272 }
0x30c6   :  { %2375 = vsyncpa [#allocation5], 1 }
0x30c7   :  { %2376 = vsyncpa [#allocation8], 1 }
0x30c8   :  { %2377 = vsyncpa [#allocation6], 1 }

</bundles_post_ra>
